<compile_context>
chip_gen: v6e
topology: v6e:2x2x1
jax: 0.10.0
libtpu: 0.0.40
codegen_flags: <defaults>
</compile_context>

<pallas_src>
import functools

import jax
import jax.numpy as jnp
from jax.experimental import pallas as pl
from jax.experimental.pallas import tpu as pltpu


_RESIDENT_WEIGHT_BUDGET = 12 << 20  # fused bf16 weight bytes; above this, stream taps from HBM


def _light_attention_kernel(x_ref, w_ref, b_ref, o_ref, *scratch,
                            K, L, E, Bb, stream, approx_recip):
    """Per-grid-step kernel.

    x_ref : (Bb, E, L)   unpadded activations (f32)
    w_ref : (K, 2E, E)   fused feat+attn tap weights; VMEM block (resident) or HBM ref (stream)
    b_ref : (2E, 1)      fused biases (f32, grid-invariant)
    o_ref : (Bb, E, L)   output block
    scratch (stream only): wbuf (2, 2E, E) bf16 VMEM, wsem DMA semaphores (2,)
    """
    pad = K // 2
    W = L + 2 * pad            # per-batch-element slot width in the lane-stacked slab
    Nwin = Bb * W - 2 * pad    # matmul N dim; covers every valid output column

    if stream:
        wbuf, wsem = scratch

        def _fetch(k, slot):
            pltpu.make_async_copy(w_ref.at[k], wbuf.at[slot], wsem.at[slot]).start()

        _fetch(0, 0)           # prime tap 0 while the slab is being built

    # ---- zero-padded, lane-stacked activation slab (E, Bb*W), bf16 ------------
    # Layout per batch element b: [pad zeros | x[b] | pad zeros]; adjacent slots
    # therefore have 2*pad zeros between them, which both provides the "same"
    # conv halo and isolates neighbouring batch elements.
    zp = jnp.zeros((E, pad), jnp.bfloat16) if pad > 0 else None
    pieces = []
    for b in range(Bb):
        if pad > 0:
            pieces.append(zp)
        pieces.append(x_ref[b].astype(jnp.bfloat16))
        if pad > 0:
            pieces.append(zp)
    slab = pieces[0] if len(pieces) == 1 else jnp.concatenate(pieces, axis=-1)

    bias = b_ref[...]          # (2E, 1) f32

    # ---- K accumulating per-tap dots: no K*E im2col expansion -----------------
    acc = jnp.zeros((2 * E, Nwin), jnp.float32)
    for k in range(K):         # static unroll; K is small (e.g. 9)
        if stream:
            slot = k % 2
            pltpu.make_async_copy(w_ref.at[k], wbuf.at[slot], wsem.at[slot]).wait()
            if k + 1 < K:
                _fetch(k + 1, 1 - slot)   # overlap next tap's DMA with this tap's dot
            w_k = wbuf[slot]              # (2E, E) bf16
        else:
            w_k = w_ref[k]                # (2E, E) bf16, resident
        acc = acc + jnp.dot(w_k, slab[:, k:k + Nwin],
                            preferred_element_type=jnp.float32)

    both = acc + bias          # (2E, Nwin) f32; feat rows [:E], attn rows [E:]

    # ---- per-batch-element softmax (over L) + reweight + store -----------------
    for b in range(Bb):
        off = b * W            # valid output columns of batch element b
        feat = both[:E, off:off + L]
        attn = both[E:, off:off + L]
        m = jnp.max(attn, axis=-1, keepdims=True)
        p = jnp.exp(attn - m)
        s = jnp.sum(p, axis=-1, keepdims=True)
        if approx_recip:
            sm = p * pl.reciprocal(s, approx=True)
        else:
            sm = p / s
        o_ref[b] = (feat * sm).astype(o_ref.dtype)


def _pick_batch_block(B, W, per_item_bytes):
    """Batch elements per grid step.

    Aim the matmul N dim (Bb*W) at a couple hundred lanes, keep the x block under
    ~8 MiB, and keep >= 2 grid steps whenever B >= 2 (v7x megacore)."""
    target = max(1, -(-256 // max(W, 1)))
    vmem_cap = max(1, (8 << 20) // max(per_item_bytes, 1))
    grid_cap = max(1, B // 2) if B >= 2 else 1
    limit = max(1, min(target, vmem_cap, grid_cap))
    best = 1
    for d in range(1, B + 1):
        if B % d == 0 and d <= limit:
            best = d
    return best


def _vmem_limit_bytes(E, L, K, Bb, Nwin, stream, out_itemsize, x_itemsize):
    pad = K // 2
    W = L + 2 * pad
    blk_x = Bb * E * L * x_itemsize
    blk_o = Bb * E * L * out_itemsize
    if stream:
        weights = 2 * (2 * E) * E * 2          # explicit (2, 2E, E) bf16 double buffer
    else:
        weights = 2 * K * (2 * E) * E * 2      # pipeline double-buffers the resident block
    temps = (E * Bb * W * 2                    # bf16 slab
             + 3 * (2 * E) * Nwin * 4          # acc / both / headroom (f32)
             + 8 * E * L * 4)                  # softmax temporaries
    need = 2 * blk_x + 2 * blk_o + weights + 2 * (2 * E * 4) + temps
    return int(min(max(need * 3 // 2 + (1 << 20), 16 << 20), 64 << 20))


def prepare_light_attention_params(w_feat, b_feat, w_attn, b_attn):
    """One-time weight fusion (do this at model load, not per forward call).

    w_*: [E_out, E_in, K] (PyTorch Conv1d layout), b_*: [E].
    Returns (w_taps: (K, 2E, E) bf16, b_both: (2E, 1) f32)."""
    E, E_in, K = w_feat.shape
    assert E == E_in and w_attn.shape == w_feat.shape
    w_both = jnp.concatenate([w_feat, w_attn], axis=0)                 # (2E, E, K)
    w_taps = jnp.transpose(w_both, (2, 0, 1)).astype(jnp.bfloat16)     # (K, 2E, E)
    b_both = jnp.concatenate([b_feat, b_attn]).reshape(2 * E, 1).astype(jnp.float32)
    return w_taps, b_both


def light_attention_forward(x, w_taps, b_both, kernel_size, *,
                            force_stream=None, out_dtype=None, approx_recip=True):
    """x: [B, E, L] float32; (w_taps, b_both) from prepare_light_attention_params."""
    B, E, L = x.shape
    K = kernel_size
    assert K % 2 == 1, "kernel_size must be odd (Conv1d 'same' padding = K//2)"
    assert w_taps.shape == (K, 2 * E, E)
    assert b_both.shape == (2 * E, 1)
    pad = K // 2
    W = L + 2 * pad
    out_dtype = x.dtype if out_dtype is None else out_dtype
    out_itemsize = jnp.dtype(out_dtype).itemsize

    Bb = _pick_batch_block(B, W, E * L * x.dtype.itemsize)
    nb = B // Bb
    Nwin = Bb * W - 2 * pad

    w_bytes = w_taps.size * w_taps.dtype.itemsize
    stream = (w_bytes > _RESIDENT_WEIGHT_BUDGET) if force_stream is None else bool(force_stream)

    kernel = functools.partial(
        _light_attention_kernel,
        K=K, L=L, E=E, Bb=Bb, stream=stream, approx_recip=approx_recip)

    x_spec = pl.BlockSpec((Bb, E, L), lambda i: (i, 0, 0))
    o_spec = pl.BlockSpec((Bb, E, L), lambda i: (i, 0, 0))
    b_spec = pl.BlockSpec((2 * E, 1), lambda i: (0, 0))                # grid-invariant (tiny)
    if stream:
        # Weights stay in HBM; the kernel double-buffers one (2E, E) tap at a time.
        w_spec = pl.BlockSpec(memory_space=pl.ANY)
        scratch_shapes = [pltpu.VMEM((2, 2 * E, E), jnp.bfloat16),
                          pltpu.SemaphoreType.DMA((2,))]
    else:
        # Small fused weights: grid-invariant resident VMEM block.
        w_spec = pl.BlockSpec((K, 2 * E, E), lambda i: (0, 0, 0))
        scratch_shapes = []

    cost = pl.CostEstimate(
        flops=2 * B * (2 * E) * E * K * L,
        transcendentals=B * E * L,
        bytes_accessed=(x.size * x.dtype.itemsize + B * E * L * out_itemsize
                        + w_bytes + b_both.size * 4))

    vmem_limit = _vmem_limit_bytes(E, L, K, Bb, Nwin, stream,
                                   out_itemsize, x.dtype.itemsize)

    out = pl.pallas_call(
        kernel,
        out_shape=jax.ShapeDtypeStruct((B, E, L), out_dtype),
        grid_spec=pltpu.PrefetchScalarGridSpec(
            num_scalar_prefetch=0,
            grid=(nb,),
            in_specs=[x_spec, w_spec, b_spec],
            out_specs=o_spec,
            scratch_shapes=scratch_shapes),
        compiler_params=pltpu.CompilerParams(
            dimension_semantics=("parallel",),
            vmem_limit_bytes=vmem_limit),
        cost_estimate=cost,
    )(x, w_taps, b_both)

    # torch.squeeze(o1, -1): only drops the last dim if it has size 1.
    if out.shape[-1] == 1:
        out = out[..., 0]
    return out


def _reference_forward(x, w_feat, b_feat, w_attn, b_attn, kernel_size):
    """Pure-JAX reference (XLA conv, f32) for correctness checking."""
    pad = kernel_size // 2
    dn = jax.lax.conv_dimension_numbers(x.shape, w_feat.shape, ("NCH", "OIH", "NCH"))
    feat = jax.lax.conv_general_dilated(x, w_feat, (1,), [(pad, pad)], dimension_numbers=dn)
    feat = feat + b_feat[None, :, None]
    attn = jax.lax.conv_general_dilated(x, w_attn, (1,), [(pad, pad)], dimension_numbers=dn)
    attn = attn + b_attn[None, :, None]
    o1 = feat * jax.nn.softmax(attn, axis=-1)
    if o1.shape[-1] == 1:
        o1 = o1[..., 0]
    return o1


if __name__ == "__main__":
    # Small shapes consistent with the module: x is [batch, embeddings_dim, seq_len].
    B, E, L, K = 8, 32, 16, 9

    key = jax.random.PRNGKey(0)
    kx, kwf, kbf, kwa, kba = jax.random.split(key, 5)

    x = jax.random.normal(kx, (B, E, L), dtype=jnp.float32)
    # Deterministic synthetic parameters (PyTorch Conv1d weight layout: [out, in, K]).
    scale = 1.0 / (E * K) ** 0.5
    w_feat = jax.random.normal(kwf, (E, E, K), dtype=jnp.float32) * scale
    b_feat = jax.random.normal(kbf, (E,), dtype=jnp.float32) * scale
    w_attn = jax.random.normal(kwa, (E, E, K), dtype=jnp.float32) * scale
    b_attn = jax.random.normal(kba, (E,), dtype=jnp.float32) * scale

    w_taps, b_both = prepare_light_attention_params(w_feat, b_feat, w_attn, b_attn)
    ref = _reference_forward(x, w_feat, b_feat, w_attn, b_attn, K)

    # Default path: small fused weights stay resident in VMEM.
    out = jax.block_until_ready(light_attention_forward(x, w_taps, b_both, K))
    assert out.shape == ref.shape == (B, E, L)
    # bf16 matmul inputs with f32 accumulation; softmax/reweight in f32 (+approx recip).
    assert jnp.allclose(out, ref, atol=2e-2, rtol=5e-2), "resident-weight path mismatch"

    # Large-E path (e.g. E=1024 on v7x): weights streamed tap-by-tap from HBM with
    # manual double-buffered DMAs.  Exercised here at small shapes for correctness.
    out_s = jax.block_until_ready(
        light_attention_forward(x, w_taps, b_both, K, force_stream=True))
    assert out_s.shape == ref.shape
    assert jnp.allclose(out_s, ref, atol=2e-2, rtol=5e-2), "streamed-weight path mismatch"

    print("KERNEL_OK")
</pallas_src>

<mosaic_0001>
module attributes {stable_mosaic.version = 11 : i64} {
  func.func @_light_attention_kernel(%arg0: i32, %arg1: memref<4x32x16xf32, #tpu.memory_space<vmem>>, %arg2: memref<9x64x32xbf16, #tpu.memory_space<vmem>>, %arg3: memref<64x1xf32, #tpu.memory_space<vmem>>, %arg4: memref<4x32x16xf32, #tpu.memory_space<vmem>>) attributes {dimension_semantics = [#tpu.dimension_semantics<parallel>], iteration_bounds = array<i64: 2>, scalar_prefetch = 0 : i64, scratch_operands = 0 : i64, tpu.core_type = #tpu.core_type<tc>, window_params = [{transform_indices = @transform_0, window_bounds = array<i64: 4, 32, 16>}, {pipeline_mode = #tpu.pipeline_mode<synchronous>, transform_indices = @transform_1, window_bounds = array<i64: 9, 64, 32>}, {pipeline_mode = #tpu.pipeline_mode<synchronous>, transform_indices = @transform_2, window_bounds = array<i64: 64, 1>}, {transform_indices = @transform_3, window_bounds = array<i64: 4, 32, 16>}]} {
    %cst = arith.constant 0.000000e+00 : bf16
    %0 = vector.broadcast %cst : bf16 to vector<32x4xbf16>
    %c0 = arith.constant 0 : index
    %c0_0 = arith.constant 0 : index
    %c0_1 = arith.constant 0 : index
    %1 = vector.load %arg1[%c0, %c0_0, %c0_1] : memref<4x32x16xf32, #tpu.memory_space<vmem>>, vector<1x32x16xf32>
    %2 = vector.shape_cast %1 : vector<1x32x16xf32> to vector<32x16xf32>
    %3 = arith.truncf %2 : vector<32x16xf32> to vector<32x16xbf16>
    %c1 = arith.constant 1 : index
    %c0_2 = arith.constant 0 : index
    %c0_3 = arith.constant 0 : index
    %4 = vector.load %arg1[%c1, %c0_2, %c0_3] : memref<4x32x16xf32, #tpu.memory_space<vmem>>, vector<1x32x16xf32>
    %5 = vector.shape_cast %4 : vector<1x32x16xf32> to vector<32x16xf32>
    %6 = arith.truncf %5 : vector<32x16xf32> to vector<32x16xbf16>
    %c2 = arith.constant 2 : index
    %c0_4 = arith.constant 0 : index
    %c0_5 = arith.constant 0 : index
    %7 = vector.load %arg1[%c2, %c0_4, %c0_5] : memref<4x32x16xf32, #tpu.memory_space<vmem>>, vector<1x32x16xf32>
    %8 = vector.shape_cast %7 : vector<1x32x16xf32> to vector<32x16xf32>
    %9 = arith.truncf %8 : vector<32x16xf32> to vector<32x16xbf16>
    %c3 = arith.constant 3 : index
    %c0_6 = arith.constant 0 : index
    %c0_7 = arith.constant 0 : index
    %10 = vector.load %arg1[%c3, %c0_6, %c0_7] : memref<4x32x16xf32, #tpu.memory_space<vmem>>, vector<1x32x16xf32>
    %11 = vector.shape_cast %10 : vector<1x32x16xf32> to vector<32x16xf32>
    %12 = arith.truncf %11 : vector<32x16xf32> to vector<32x16xbf16>
    %13 = tpu.concatenate %0, %3, %0, %0, %6, %0, %0, %9, %0, %0, %12, %0 in 1 : vector<32x4xbf16>, vector<32x16xbf16>, vector<32x4xbf16>, vector<32x4xbf16>, vector<32x16xbf16>, vector<32x4xbf16>, vector<32x4xbf16>, vector<32x16xbf16>, vector<32x4xbf16>, vector<32x4xbf16>, vector<32x16xbf16>, vector<32x4xbf16> -> vector<32x96xbf16>
    %c0_8 = arith.constant 0 : index
    %c0_9 = arith.constant 0 : index
    %14 = vector.load %arg3[%c0_8, %c0_9] : memref<64x1xf32, #tpu.memory_space<vmem>>, vector<64x1xf32>
    %cst_10 = arith.constant 0.000000e+00 : f32
    %15 = vector.broadcast %cst_10 : f32 to vector<64x88xf32>
    %c0_11 = arith.constant 0 : index
    %c0_12 = arith.constant 0 : index
    %c0_13 = arith.constant 0 : index
    %16 = vector.load %arg2[%c0_11, %c0_12, %c0_13] : memref<9x64x32xbf16, #tpu.memory_space<vmem>>, vector<1x64x32xbf16>
    %17 = vector.shape_cast %16 : vector<1x64x32xbf16> to vector<64x32xbf16>
    %18 = vector.extract_strided_slice %13 {offsets = [0, 0], sizes = [32, 88], strides = [1, 1]} : vector<32x96xbf16> to vector<32x88xbf16>
    %cst_14 = arith.constant dense<0.000000e+00> : vector<64x88xf32>
    %19 = tpu.matmul %17, %18, %cst_14 {dimension_numbers = #tpu.dot_dimension_numbers<[1], [0], [0], [1], [0, 0, 1, 1], [], []>} : vector<64x32xbf16>, vector<32x88xbf16>, vector<64x88xf32> -> vector<64x88xf32>
    %20 = arith.addf %15, %19 : vector<64x88xf32>
    %c1_15 = arith.constant 1 : index
    %c0_16 = arith.constant 0 : index
    %c0_17 = arith.constant 0 : index
    %21 = vector.load %arg2[%c1_15, %c0_16, %c0_17] : memref<9x64x32xbf16, #tpu.memory_space<vmem>>, vector<1x64x32xbf16>
    %22 = vector.shape_cast %21 : vector<1x64x32xbf16> to vector<64x32xbf16>
    %23 = vector.extract_strided_slice %13 {offsets = [0, 1], sizes = [32, 88], strides = [1, 1]} : vector<32x96xbf16> to vector<32x88xbf16>
    %cst_18 = arith.constant dense<0.000000e+00> : vector<64x88xf32>
    %24 = tpu.matmul %22, %23, %cst_18 {dimension_numbers = #tpu.dot_dimension_numbers<[1], [0], [0], [1], [0, 0, 1, 1], [], []>} : vector<64x32xbf16>, vector<32x88xbf16>, vector<64x88xf32> -> vector<64x88xf32>
    %25 = arith.addf %20, %24 : vector<64x88xf32>
    %c2_19 = arith.constant 2 : index
    %c0_20 = arith.constant 0 : index
    %c0_21 = arith.constant 0 : index
    %26 = vector.load %arg2[%c2_19, %c0_20, %c0_21] : memref<9x64x32xbf16, #tpu.memory_space<vmem>>, vector<1x64x32xbf16>
    %27 = vector.shape_cast %26 : vector<1x64x32xbf16> to vector<64x32xbf16>
    %28 = vector.extract_strided_slice %13 {offsets = [0, 2], sizes = [32, 88], strides = [1, 1]} : vector<32x96xbf16> to vector<32x88xbf16>
    %cst_22 = arith.constant dense<0.000000e+00> : vector<64x88xf32>
    %29 = tpu.matmul %27, %28, %cst_22 {dimension_numbers = #tpu.dot_dimension_numbers<[1], [0], [0], [1], [0, 0, 1, 1], [], []>} : vector<64x32xbf16>, vector<32x88xbf16>, vector<64x88xf32> -> vector<64x88xf32>
    %30 = arith.addf %25, %29 : vector<64x88xf32>
    %c3_23 = arith.constant 3 : index
    %c0_24 = arith.constant 0 : index
    %c0_25 = arith.constant 0 : index
    %31 = vector.load %arg2[%c3_23, %c0_24, %c0_25] : memref<9x64x32xbf16, #tpu.memory_space<vmem>>, vector<1x64x32xbf16>
    %32 = vector.shape_cast %31 : vector<1x64x32xbf16> to vector<64x32xbf16>
    %33 = vector.extract_strided_slice %13 {offsets = [0, 3], sizes = [32, 88], strides = [1, 1]} : vector<32x96xbf16> to vector<32x88xbf16>
    %cst_26 = arith.constant dense<0.000000e+00> : vector<64x88xf32>
    %34 = tpu.matmul %32, %33, %cst_26 {dimension_numbers = #tpu.dot_dimension_numbers<[1], [0], [0], [1], [0, 0, 1, 1], [], []>} : vector<64x32xbf16>, vector<32x88xbf16>, vector<64x88xf32> -> vector<64x88xf32>
    %35 = arith.addf %30, %34 : vector<64x88xf32>
    %c4 = arith.constant 4 : index
    %c0_27 = arith.constant 0 : index
    %c0_28 = arith.constant 0 : index
    %36 = vector.load %arg2[%c4, %c0_27, %c0_28] : memref<9x64x32xbf16, #tpu.memory_space<vmem>>, vector<1x64x32xbf16>
    %37 = vector.shape_cast %36 : vector<1x64x32xbf16> to vector<64x32xbf16>
    %38 = vector.extract_strided_slice %13 {offsets = [0, 4], sizes = [32, 88], strides = [1, 1]} : vector<32x96xbf16> to vector<32x88xbf16>
    %cst_29 = arith.constant dense<0.000000e+00> : vector<64x88xf32>
    %39 = tpu.matmul %37, %38, %cst_29 {dimension_numbers = #tpu.dot_dimension_numbers<[1], [0], [0], [1], [0, 0, 1, 1], [], []>} : vector<64x32xbf16>, vector<32x88xbf16>, vector<64x88xf32> -> vector<64x88xf32>
    %40 = arith.addf %35, %39 : vector<64x88xf32>
    %c5 = arith.constant 5 : index
    %c0_30 = arith.constant 0 : index
    %c0_31 = arith.constant 0 : index
    %41 = vector.load %arg2[%c5, %c0_30, %c0_31] : memref<9x64x32xbf16, #tpu.memory_space<vmem>>, vector<1x64x32xbf16>
    %42 = vector.shape_cast %41 : vector<1x64x32xbf16> to vector<64x32xbf16>
    %43 = vector.extract_strided_slice %13 {offsets = [0, 5], sizes = [32, 88], strides = [1, 1]} : vector<32x96xbf16> to vector<32x88xbf16>
    %cst_32 = arith.constant dense<0.000000e+00> : vector<64x88xf32>
    %44 = tpu.matmul %42, %43, %cst_32 {dimension_numbers = #tpu.dot_dimension_numbers<[1], [0], [0], [1], [0, 0, 1, 1], [], []>} : vector<64x32xbf16>, vector<32x88xbf16>, vector<64x88xf32> -> vector<64x88xf32>
    %45 = arith.addf %40, %44 : vector<64x88xf32>
    %c6 = arith.constant 6 : index
    %c0_33 = arith.constant 0 : index
    %c0_34 = arith.constant 0 : index
    %46 = vector.load %arg2[%c6, %c0_33, %c0_34] : memref<9x64x32xbf16, #tpu.memory_space<vmem>>, vector<1x64x32xbf16>
    %47 = vector.shape_cast %46 : vector<1x64x32xbf16> to vector<64x32xbf16>
    %48 = vector.extract_strided_slice %13 {offsets = [0, 6], sizes = [32, 88], strides = [1, 1]} : vector<32x96xbf16> to vector<32x88xbf16>
    %cst_35 = arith.constant dense<0.000000e+00> : vector<64x88xf32>
    %49 = tpu.matmul %47, %48, %cst_35 {dimension_numbers = #tpu.dot_dimension_numbers<[1], [0], [0], [1], [0, 0, 1, 1], [], []>} : vector<64x32xbf16>, vector<32x88xbf16>, vector<64x88xf32> -> vector<64x88xf32>
    %50 = arith.addf %45, %49 : vector<64x88xf32>
    %c7 = arith.constant 7 : index
    %c0_36 = arith.constant 0 : index
    %c0_37 = arith.constant 0 : index
    %51 = vector.load %arg2[%c7, %c0_36, %c0_37] : memref<9x64x32xbf16, #tpu.memory_space<vmem>>, vector<1x64x32xbf16>
    %52 = vector.shape_cast %51 : vector<1x64x32xbf16> to vector<64x32xbf16>
    %53 = vector.extract_strided_slice %13 {offsets = [0, 7], sizes = [32, 88], strides = [1, 1]} : vector<32x96xbf16> to vector<32x88xbf16>
    %cst_38 = arith.constant dense<0.000000e+00> : vector<64x88xf32>
    %54 = tpu.matmul %52, %53, %cst_38 {dimension_numbers = #tpu.dot_dimension_numbers<[1], [0], [0], [1], [0, 0, 1, 1], [], []>} : vector<64x32xbf16>, vector<32x88xbf16>, vector<64x88xf32> -> vector<64x88xf32>
    %55 = arith.addf %50, %54 : vector<64x88xf32>
    %c8 = arith.constant 8 : index
    %c0_39 = arith.constant 0 : index
    %c0_40 = arith.constant 0 : index
    %56 = vector.load %arg2[%c8, %c0_39, %c0_40] : memref<9x64x32xbf16, #tpu.memory_space<vmem>>, vector<1x64x32xbf16>
    %57 = vector.shape_cast %56 : vector<1x64x32xbf16> to vector<64x32xbf16>
    %58 = vector.extract_strided_slice %13 {offsets = [0, 8], sizes = [32, 88], strides = [1, 1]} : vector<32x96xbf16> to vector<32x88xbf16>
    %cst_41 = arith.constant dense<0.000000e+00> : vector<64x88xf32>
    %59 = tpu.matmul %57, %58, %cst_41 {dimension_numbers = #tpu.dot_dimension_numbers<[1], [0], [0], [1], [0, 0, 1, 1], [], []>} : vector<64x32xbf16>, vector<32x88xbf16>, vector<64x88xf32> -> vector<64x88xf32>
    %60 = arith.addf %55, %59 : vector<64x88xf32>
    %61 = vector.broadcast %14 : vector<64x1xf32> to vector<64x88xf32>
    %62 = arith.addf %60, %61 : vector<64x88xf32>
    %63 = vector.extract_strided_slice %62 {offsets = [0, 0], sizes = [32, 16], strides = [1, 1]} : vector<64x88xf32> to vector<32x16xf32>
    %64 = vector.extract_strided_slice %62 {offsets = [32, 0], sizes = [32, 16], strides = [1, 1]} : vector<64x88xf32> to vector<32x16xf32>
    %cst_42 = arith.constant dense<0xFF800000> : vector<32xf32>
    %65 = vector.multi_reduction <maximumf>, %64, %cst_42 [1] : vector<32x16xf32> to vector<32xf32>
    %66 = vector.shape_cast %65 : vector<32xf32> to vector<32x1xf32>
    %67 = vector.broadcast %66 : vector<32x1xf32> to vector<32x16xf32>
    %68 = arith.subf %64, %67 : vector<32x16xf32>
    %69 = math.exp %68 : vector<32x16xf32>
    %cst_43 = arith.constant dense<0.000000e+00> : vector<32xf32>
    %70 = vector.multi_reduction <add>, %69, %cst_43 [1] : vector<32x16xf32> to vector<32xf32>
    %71 = vector.shape_cast %70 : vector<32xf32> to vector<32x1xf32>
    %72 = tpu.reciprocal %71 {approx = true} : vector<32x1xf32> -> vector<32x1xf32>
    %73 = vector.broadcast %72 : vector<32x1xf32> to vector<32x16xf32>
    %74 = arith.mulf %69, %73 : vector<32x16xf32>
    %75 = arith.mulf %63, %74 : vector<32x16xf32>
    %c0_44 = arith.constant 0 : index
    %c0_45 = arith.constant 0 : index
    %c0_46 = arith.constant 0 : index
    %76 = vector.load %arg4[%c0_44, %c0_45, %c0_46] : memref<4x32x16xf32, #tpu.memory_space<vmem>>, vector<1x32x16xf32>
    %77 = vector.shape_cast %76 : vector<1x32x16xf32> to vector<32x16xf32>
    %78 = vector.shape_cast %75 : vector<32x16xf32> to vector<1x32x16xf32>
    tpu.vector_store %arg4[%c0_44, %c0_45, %c0_46], %78 {strides = array<i32>} : memref<4x32x16xf32, #tpu.memory_space<vmem>>, vector<1x32x16xf32>,
    %79 = vector.extract_strided_slice %62 {offsets = [0, 24], sizes = [32, 16], strides = [1, 1]} : vector<64x88xf32> to vector<32x16xf32>
    %80 = vector.extract_strided_slice %62 {offsets = [32, 24], sizes = [32, 16], strides = [1, 1]} : vector<64x88xf32> to vector<32x16xf32>
    %cst_47 = arith.constant dense<0xFF800000> : vector<32xf32>
    %81 = vector.multi_reduction <maximumf>, %80, %cst_47 [1] : vector<32x16xf32> to vector<32xf32>
    %82 = vector.shape_cast %81 : vector<32xf32> to vector<32x1xf32>
    %83 = vector.broadcast %82 : vector<32x1xf32> to vector<32x16xf32>
    %84 = arith.subf %80, %83 : vector<32x16xf32>
    %85 = math.exp %84 : vector<32x16xf32>
    %cst_48 = arith.constant dense<0.000000e+00> : vector<32xf32>
    %86 = vector.multi_reduction <add>, %85, %cst_48 [1] : vector<32x16xf32> to vector<32xf32>
    %87 = vector.shape_cast %86 : vector<32xf32> to vector<32x1xf32>
    %88 = tpu.reciprocal %87 {approx = true} : vector<32x1xf32> -> vector<32x1xf32>
    %89 = vector.broadcast %88 : vector<32x1xf32> to vector<32x16xf32>
    %90 = arith.mulf %85, %89 : vector<32x16xf32>
    %91 = arith.mulf %79, %90 : vector<32x16xf32>
    %c1_49 = arith.constant 1 : index
    %c0_50 = arith.constant 0 : index
    %c0_51 = arith.constant 0 : index
    %92 = vector.load %arg4[%c1_49, %c0_50, %c0_51] : memref<4x32x16xf32, #tpu.memory_space<vmem>>, vector<1x32x16xf32>
    %93 = vector.shape_cast %92 : vector<1x32x16xf32> to vector<32x16xf32>
    %94 = vector.shape_cast %91 : vector<32x16xf32> to vector<1x32x16xf32>
    tpu.vector_store %arg4[%c1_49, %c0_50, %c0_51], %94 {strides = array<i32>} : memref<4x32x16xf32, #tpu.memory_space<vmem>>, vector<1x32x16xf32>,
    %95 = vector.extract_strided_slice %62 {offsets = [0, 48], sizes = [32, 16], strides = [1, 1]} : vector<64x88xf32> to vector<32x16xf32>
    %96 = vector.extract_strided_slice %62 {offsets = [32, 48], sizes = [32, 16], strides = [1, 1]} : vector<64x88xf32> to vector<32x16xf32>
    %cst_52 = arith.constant dense<0xFF800000> : vector<32xf32>
    %97 = vector.multi_reduction <maximumf>, %96, %cst_52 [1] : vector<32x16xf32> to vector<32xf32>
    %98 = vector.shape_cast %97 : vector<32xf32> to vector<32x1xf32>
    %99 = vector.broadcast %98 : vector<32x1xf32> to vector<32x16xf32>
    %100 = arith.subf %96, %99 : vector<32x16xf32>
    %101 = math.exp %100 : vector<32x16xf32>
    %cst_53 = arith.constant dense<0.000000e+00> : vector<32xf32>
    %102 = vector.multi_reduction <add>, %101, %cst_53 [1] : vector<32x16xf32> to vector<32xf32>
    %103 = vector.shape_cast %102 : vector<32xf32> to vector<32x1xf32>
    %104 = tpu.reciprocal %103 {approx = true} : vector<32x1xf32> -> vector<32x1xf32>
    %105 = vector.broadcast %104 : vector<32x1xf32> to vector<32x16xf32>
    %106 = arith.mulf %101, %105 : vector<32x16xf32>
    %107 = arith.mulf %95, %106 : vector<32x16xf32>
    %c2_54 = arith.constant 2 : index
    %c0_55 = arith.constant 0 : index
    %c0_56 = arith.constant 0 : index
    %108 = vector.load %arg4[%c2_54, %c0_55, %c0_56] : memref<4x32x16xf32, #tpu.memory_space<vmem>>, vector<1x32x16xf32>
    %109 = vector.shape_cast %108 : vector<1x32x16xf32> to vector<32x16xf32>
    %110 = vector.shape_cast %107 : vector<32x16xf32> to vector<1x32x16xf32>
    tpu.vector_store %arg4[%c2_54, %c0_55, %c0_56], %110 {strides = array<i32>} : memref<4x32x16xf32, #tpu.memory_space<vmem>>, vector<1x32x16xf32>,
    %111 = vector.extract_strided_slice %62 {offsets = [0, 72], sizes = [32, 16], strides = [1, 1]} : vector<64x88xf32> to vector<32x16xf32>
    %112 = vector.extract_strided_slice %62 {offsets = [32, 72], sizes = [32, 16], strides = [1, 1]} : vector<64x88xf32> to vector<32x16xf32>
    %cst_57 = arith.constant dense<0xFF800000> : vector<32xf32>
    %113 = vector.multi_reduction <maximumf>, %112, %cst_57 [1] : vector<32x16xf32> to vector<32xf32>
    %114 = vector.shape_cast %113 : vector<32xf32> to vector<32x1xf32>
    %115 = vector.broadcast %114 : vector<32x1xf32> to vector<32x16xf32>
    %116 = arith.subf %112, %115 : vector<32x16xf32>
    %117 = math.exp %116 : vector<32x16xf32>
    %cst_58 = arith.constant dense<0.000000e+00> : vector<32xf32>
    %118 = vector.multi_reduction <add>, %117, %cst_58 [1] : vector<32x16xf32> to vector<32xf32>
    %119 = vector.shape_cast %118 : vector<32xf32> to vector<32x1xf32>
    %120 = tpu.reciprocal %119 {approx = true} : vector<32x1xf32> -> vector<32x1xf32>
    %121 = vector.broadcast %120 : vector<32x1xf32> to vector<32x16xf32>
    %122 = arith.mulf %117, %121 : vector<32x16xf32>
    %123 = arith.mulf %111, %122 : vector<32x16xf32>
    %c3_59 = arith.constant 3 : index
    %c0_60 = arith.constant 0 : index
    %c0_61 = arith.constant 0 : index
    %124 = vector.load %arg4[%c3_59, %c0_60, %c0_61] : memref<4x32x16xf32, #tpu.memory_space<vmem>>, vector<1x32x16xf32>
    %125 = vector.shape_cast %124 : vector<1x32x16xf32> to vector<32x16xf32>
    %126 = vector.shape_cast %123 : vector<32x16xf32> to vector<1x32x16xf32>
    tpu.vector_store %arg4[%c3_59, %c0_60, %c0_61], %126 {strides = array<i32>} : memref<4x32x16xf32, #tpu.memory_space<vmem>>, vector<1x32x16xf32>,
    return
  }
  func.func @transform_0(%arg0: i32) -> (i32, i32, i32) {
    %c0_i32 = arith.constant 0 : i32
    %c0_i32_0 = arith.constant 0 : i32
    %c0_i32_1 = arith.constant 0 : i32
    return %arg0, %c0_i32, %c0_i32_0 : i32, i32, i32
  }
  func.func @transform_1(%arg0: i32) -> (i32, i32, i32) {
    %c0_i32 = arith.constant 0 : i32
    %c0_i32_0 = arith.constant 0 : i32
    %c0_i32_1 = arith.constant 0 : i32
    %c0_i32_2 = arith.constant 0 : i32
    return %c0_i32, %c0_i32_0, %c0_i32_1 : i32, i32, i32
  }
  func.func @transform_2(%arg0: i32) -> (i32, i32) {
    %c0_i32 = arith.constant 0 : i32
    %c0_i32_0 = arith.constant 0 : i32
    %c0_i32_1 = arith.constant 0 : i32
    return %c0_i32, %c0_i32_0 : i32, i32
  }
  func.func @transform_3(%arg0: i32) -> (i32, i32, i32) {
    %c0_i32 = arith.constant 0 : i32
    %c0_i32_0 = arith.constant 0 : i32
    %c0_i32_1 = arith.constant 0 : i32
    return %arg0, %c0_i32, %c0_i32_0 : i32, i32, i32
  }
}

</mosaic_0001>

<bundles_post_ra>
// kernel: tpu_custom_call.1
= control target key start
LH: loop header
LB: loop body
LE: loop exit
PB: predicated region body
PF: predicated region fallthrough
CT: control target
= control target key end

     0   :  { %s2273_s12 = smov 0   ;;  %s2749_s0 = inlined_call_operand.vmem [shape: f32[8,32,16], index: 0, kind: input, shape index: {}]   ;;  %s2750_s1 = inlined_call_operand.vmem [shape: bf16[9,64,32], index: 1, kind: input, shape index: {}]   ;;  %s2751_s2 = inlined_call_operand.vmem [shape: f32[64,1], index: 2, kind: input, shape index: {}]   ;;  %s2752_s3 = inlined_call_operand.vmem [shape: f32[8,32,16], index: 3, kind: output, shape index: {}]  }
   0x1 LB: > { %s1760_s13 = sadd.s32 4294967295, %s2235_s12   ;;  %p1764_p0 = scmp.ge.s32.totalorder %s2235_s12, 1  ;;  %s2235_s12 = sphi %s2273_s12, %s13_s12  }
   0x2   : > { %p139_p1 = scmp.lt.s32.totalorder %s2235_s12, 3 }
   0x4   : > { %p140_p2 = pnand %p1764_p0, %p139_p1 }
   0x5   : > { %s1765_s14 = sshll.u32 (!%p140_p2), %s1760_s13, 2  ;;  %s2237_s19 = smov (!%p140_p2), 4  }
   0x6   : > { %143 = sbr.rel (%p140_p2) target bundleno = 1171 (0x493), region = 32  ;;  %p166_p3 = scmp.lt.s32.totalorder (!%p140_p2), %s1765_s14, 7 }
   0x7   : > { %s2238_s20 = smov (!%p140_p2), 28   ;;  %s2239_s21 = smov (!%p140_p2), 52  }
   0x8   : > { %s2240_s22 = smov (!%p140_p2), 76   ;;  %s2241_s27 = smov (!%p140_p2), 127  }
   0x9   : > { %s2242_s28 = smov (!%p140_p2), 126   ;;  %s2243_s29 = smov (!%p140_p2), 125  }
   0xa   : > { %s2244_s30 = smov (!%p140_p2), 124   ;;  %s2245_s4 = smov (!%p140_p2), 123  }
   0xb   : > { %s2754_s14 = smov (!%p166_p3, %s1765_s14), 7  ;;  %vm231_vm0 = vcmask 31744   ;;  %vm237_vm1 = vcmask 162816   ;;  %vm240_vm2 = vcmask 195584   ;;  %vm243_vm3 = vcmask 228352   ;;  %v2129_v35 = vld [vmem:[%s2750_s1 + $0x20] sm:$0xff]  }
   0xc   : > { %s1933_s15 = sshll.u32 %s2754_s14, 5  ;;  %vm248_vm4 = vcmask 359424   ;;  %vm251_vm5 = vcmask 392192   ;;  %vm254_vm6 = vcmask 424960   ;;  %vm259_vm7 = vcmask 556032   ;;  %v2130_v36 = vld [vmem:[%s2750_s1 + $0x30] sm:$0xff]  }
   0xd   : > { %s170_s18 = scalar_lea.vmem %s2749_s0, %s1933_s15  ;;  %vm262_vm8 = vcmask 588800   ;;  %vm328_vm9 = vcmask 261120   ;;  %vm265_vm10 = vcmask 621568   ;;  %vm270_vm11 = vcmask 752640   ;;  %s2246_s5 = smov 122   ;;  %v280_v56 = vld [vmem:[%s2751_s2 + $0x28] sm:$0xff] }
   0xe   : > { %v182_v0 = vld [vmem:[%s170_s18 + $0x10] sm:$0xff]  ;;  %v183_v1 = vld [vmem:[%s170_s18 + $0x18] sm:$0xff]  ;;  %v180_v2 = vld [vmem:[%s170_s18] sm:$0xff]  ;;  %1993 = vmatprep.mubr.msk.bf16.mxu0 %vm328_vm9, %v2129_v35  ;;  %1997 = vmatprep.mubr.msk.bf16.mxu1 %vm328_vm9, %v2130_v36  ;;  %s2247_s6 = smov 121   ;;  %s2248_s7 = smov 120   ;;  %v2249_v58 = vmov 0  }
   0xf   : > { %v185_v3 = vpack.c.bf16 %v183_v1, %v182_v0  ;;  %v181_v4 = vld [vmem:[%s170_s18 + $0x8] sm:$0xff]  ;;  %v1773_v5 = vld [vmem:[%s170_s18 + $0x30] sm:$0xff]  ;;  %v1774_v6 = vld [vmem:[%s170_s18 + $0x38] sm:$0xff]  ;;  %2128 = vset.pattern.permute.xlu1 %v2249_v58  ;;  %2127 = vset.pattern.permute.xlu0 %v2249_v58  ;;  %vm1444_vm12 = vcmask 326848   ;;  %vm1530_vm13 = vcmask 523648   ;;  %vm1391_vm14 = vcmask 130048  }
  0x10   : > { %v184_v7 = vpack.c.bf16 %v181_v4, %v180_v2  ;;  %v1777_v8 = vld [vmem:[%s170_s18 + $0x50] sm:$0xff]  ;;  %v1778_v9 = vld [vmem:[%s170_s18 + $0x58] sm:$0xff]  ;;  %v192_v10 = vpack.c.bf16 %v1774_v6, %v1773_v5  ;;  %v1771_v12 = vld [vmem:[%s170_s18 + $0x20] sm:$0xff]  ;;  %vm1616_vm15 = vcmask 720448   ;;  %s2250_s13 = smov 104   ;;  %s2251_s16 = smov 80  }
  0x11   : > { %211 = vrot.lane.b32.xlu0 %v185_v3, %s2237_s19  ;;  %v199_v11 = vpack.c.bf16 %v1778_v9, %v1777_v8  ;;  %v1772_v13 = vld [vmem:[%s170_s18 + $0x28] sm:$0xff]  ;;  %v1781_v14 = vld [vmem:[%s170_s18 + $0x70] sm:$0xff]  ;;  %v1782_v15 = vld [vmem:[%s170_s18 + $0x78] sm:$0xff]  ;;  %s2252_s17 = smov 56  }
  0x12   : > { %209 = vrot.lane.b32.xlu1 %v184_v7, %s2237_s19  ;;  %v1775_v16 = vld [vmem:[%s170_s18 + $0x40] sm:$0xff]  ;;  %v1776_v17 = vld [vmem:[%s170_s18 + $0x48] sm:$0xff]  ;;  %v191_v18 = vpack.c.bf16 %v1772_v13, %v1771_v12  ;;  %v206_v21 = vpack.c.bf16 %v1782_v15, %v1781_v14  ;;  %v281_v59 = vld [vmem:[%s2751_s2 + $0x30] sm:$0xff] }
  0x13   : > { %v1779_v19 = vld [vmem:[%s170_s18 + $0x60] sm:$0xff]  ;;  %v1780_v20 = vld [vmem:[%s170_s18 + $0x68] sm:$0xff]  ;;  %v198_v22 = vpack.c.bf16 %v1776_v17, %v1775_v16  ;;  %v282_v60 = vld [vmem:[%s2751_s2 + $0x38] sm:$0xff] }
  0x14   : > { %v205_v23 = vpack.c.bf16 %v1780_v20, %v1779_v19  ;;  %v279_v57 = vld [vmem:[%s2751_s2 + $0x20] sm:$0xff]  ;;  %v2131_v0 = vld [vmem:[%s2750_s1 + $0x28] sm:$0xff]   ;;  %v2132_v1 = vld [vmem:[%s2750_s1 + $0x38] sm:$0xff]  }
  0x15   : > { %217 = vrot.lane.b32.xlu0 %v192_v10, %s2238_s20  ;;  %v2133_v3 = vld [vmem:[%s2750_s1] sm:$0xff]   ;;  %v2135_v7 = vld [vmem:[%s2750_s1 + $0x8] sm:$0xff]   ;;  %v2138_v12 = vld [vmem:[%s2750_s1 + $0x50] sm:$0xff]  }
  0x16   : > { %223 = vrot.lane.b32.xlu1 %v199_v11, %s2239_s21  ;;  %v2134_v4 = vld [vmem:[%s2750_s1 + $0x40] sm:$0xff]   ;;  %v2136_v8 = vld [vmem:[%s2750_s1 + $0x48] sm:$0xff]   ;;  %v2137_v11 = vld [vmem:[%s2750_s1 + $0x10] sm:$0xff]  }
  0x17   : > { %v2139_v13 = vld [vmem:[%s2750_s1 + $0x18] sm:$0xff]   ;;  %v2141_v17 = vld [vmem:[%s2750_s1 + $0x60] sm:$0xff]   ;;  %v2143_v19 = vld [vmem:[%s2750_s1 + $0x68] sm:$0xff]  }
  0x18   : > { %v2140_v14 = vld [vmem:[%s2750_s1 + $0x58] sm:$0xff]   ;;  %v2144_v20 = vld [vmem:[%s2750_s1 + $0x88] sm:$0xff]  }
  0x19   : > { %215 = vrot.lane.b32.xlu0 %v191_v18, %s2238_s20  ;;  %v2142_v18 = vld [vmem:[%s2750_s1 + $0x80] sm:$0xff]  }
  0x1a   : > { %229 = vrot.lane.b32.xlu1 %v206_v21, %s2240_s22 }
  0x1d   : > { %221 = vrot.lane.b32.xlu0 %v198_v22, %s2239_s21 }
  0x1e   : > { %227 = vrot.lane.b32.xlu1 %v205_v23, %s2240_s22  ;;  %v2145_v23 = vld [vmem:[%s2750_s1 + $0x70] sm:$0xff]  }
  0x83   : > { %v212_v24 = vpop.permute.xlu0 %211 }
  0x84   : > { %v236_v25 = vsel %vm231_vm0, 0, %v212_v24  ;;  %v210_v26 = vpop.permute.xlu1 %209  ;;  %v2146_v24 = vld [vmem:[%s2750_s1 + $0x90] sm:$0xff]  }
  0x85   : > { %v239_v27 = vsel %vm237_vm1, %v236_v25, 0  ;;  %v234_v28 = vsel %vm231_vm0, 0, %v210_v26  ;;  %v2147_v25 = vld [vmem:[%s2750_s1 + $0x78] sm:$0xff]  }
  0x86   : > { %v242_v29 = vsel %vm240_vm2, %v239_v27, 0  ;;  %v238_v31 = vsel %vm237_vm1, %v234_v28, 0  ;;  %v2148_v26 = vld [vmem:[%s2750_s1 + $0x98] sm:$0xff]  }
  0x87   : > { %v218_v30 = vpop.permute.xlu0 %217  ;;  %v241_v38 = vsel %vm240_vm2, %v238_v31, 0  ;;  %v2151_v31 = vld [vmem:[%s2750_s1 + $0xa8] sm:$0xff]  }
  0x88   : > { %v247_v32 = vsel %vm243_vm3, %v242_v29, %v218_v30  ;;  %v224_v33 = vpop.permute.xlu1 %223  ;;  %v2149_v29 = vld [vmem:[%s2750_s1 + $0xa0] sm:$0xff]  }
  0x89   : > { %v250_v34 = vsel %vm248_vm4, %v247_v32, 0  ;;  %v2150_v30 = vld [vmem:[%s2750_s1 + $0xc0] sm:$0xff]   ;;  %v2152_v32 = vld [vmem:[%s2750_s1 + $0xc8] sm:$0xff]  }
  0x8a   : > { %v253_v37 = vsel %vm251_vm5, %v250_v34, 0  ;;  %v2154_v34 = vld [vmem:[%s2750_s1 + $0xd0] sm:$0xff]  }
  0x8b   : > { %v258_v39 = vsel %vm254_vm6, %v253_v37, %v224_v33  ;;  %v216_v40 = vpop.permute.xlu0 %215  ;;  %v2153_v33 = vld [vmem:[%s2750_s1 + $0xb0] sm:$0xff]   ;;  %v2155_v37 = vld [vmem:[%s2750_s1 + $0xb8] sm:$0xff]  }
  0x8c   : > { %v261_v41 = vsel %vm259_vm7, %v258_v39, 0  ;;  %v245_v42 = vsel %vm243_vm3, %v241_v38, %v216_v40  ;;  %v230_v43 = vpop.permute.xlu1 %229  ;;  %v2156_v38 = vld [vmem:[%s2750_s1 + $0xd8] sm:$0xff]   ;;  %v2157_v39 = vld [vmem:[%s2750_s1 + $0xe0] sm:$0xff]  }
  0x8d   : > { %v264_v44 = vsel %vm262_vm8, %v261_v41, 0  ;;  %v249_v45 = vsel %vm248_vm4, %v245_v42, 0  ;;  %v2158_v40 = vld [vmem:[%s2750_s1 + $0x100] sm:$0xff]   ;;  %v2159_v41 = vld [vmem:[%s2750_s1 + $0xe8] sm:$0xff]  }
  0x8e   : > { %v252_v46 = vsel %vm251_vm5, %v249_v45, 0  ;;  %v269_v47 = vsel %vm265_vm10, %v264_v44, %v230_v43  ;;  %v2160_v42 = vld [vmem:[%s2750_s1 + $0x108] sm:$0xff]   ;;  %v2161_v43 = vld [vmem:[%s2750_s1 + $0xf0] sm:$0xff]   ;;  %v2163_v45 = vld [vmem:[%s2750_s1 + $0xf8] sm:$0xff]  }
  0x8f   : > { %v2310_v48 = vsel %vm270_vm11, %v269_v47, 0  ;;  %v222_v49 = vpop.permute.xlu0 %221  ;;  %v2162_v44 = vld [vmem:[%s2750_s1 + $0x110] sm:$0xff]  }
  0x90   : > { %v256_v50 = vsel %vm254_vm6, %v252_v46, %v222_v49  ;;  %324 = vrot.lane.b32.xlu0 %v2310_v48, %s2241_s27  ;;  %v228_v51 = vpop.permute.xlu1 %227  ;;  %v2164_v46 = vld [vmem:[%s2750_s1 + $0x118] sm:$0xff]  }
  0x91   : > { %v260_v52 = vsel %vm259_vm7, %v256_v50, 0 }
  0x92   : > { %v263_v53 = vsel %vm262_vm8, %v260_v52, 0 }
  0x93   : > { %v267_v54 = vsel %vm265_vm10, %v263_v53, %v228_v51 }
  0x94   : > { %v2318_v55 = vsel %vm270_vm11, %v267_v54, 0  ;;  %534 = vrot.lane.b32.xlu0 %v2310_v48, %s2242_s28 }
  0x95   : > { %322 = vrot.lane.b32.xlu1 %v2318_v55, %s2241_s27 }
  0x98   : > { %654 = vrot.lane.b32.xlu0 %v2310_v48, %s2243_s29 }
  0x99   : > { %532 = vrot.lane.b32.xlu1 %v2318_v55, %s2242_s28  ;;  %s2685_s28 = scalar_lea.vmem %s2752_s3, %s1933_s15 }
  0x9c   : > { %652 = vrot.lane.b32.xlu0 %v2318_v55, %s2243_s29 }
  0x9d   : > { %774 = vrot.lane.b32.xlu1 %v2310_v48, %s2244_s30 }
  0xa0   : > { %894 = vrot.lane.b32.xlu0 %v2310_v48, %s2245_s4 }
  0xa1   : > { %772 = vrot.lane.b32.xlu1 %v2318_v55, %s2244_s30 }
  0xa4   : > { %892 = vrot.lane.b32.xlu0 %v2318_v55, %s2245_s4 }
  0xa5   : > { %1014 = vrot.lane.b32.xlu1 %v2310_v48, %s2246_s5 }
  0xa8   : > { %1134 = vrot.lane.b32.xlu0 %v2310_v48, %s2247_s6 }
  0xa9   : > { %1012 = vrot.lane.b32.xlu1 %v2318_v55, %s2246_s5 }
  0xac   : > { %1132 = vrot.lane.b32.xlu0 %v2318_v55, %s2247_s6 }
  0xad   : > { %1254 = vrot.lane.b32.xlu1 %v2310_v48, %s2248_s7 }
  0xb0   : > { %1365 = vperm.xlu0 %2127, %v279_v57  }
  0xb1   : > { %1252 = vrot.lane.b32.xlu1 %v2318_v55, %s2248_s7 }
  0xb4   : > { %1380 = vperm.xlu0 %2127, %v282_v60  }
  0xb5   : > { %1370 = vperm.xlu1 %2128, %v280_v56  }
  0xb9   : > { %1375 = vperm.xlu1 %2128, %v281_v59  }
 0x102   : > { %v325_v61 = vpop.permute.xlu0 %324 }
 0x103   : > { %1989 = vmatprep.subr.bf16.mxu0 %v325_v61  ;;  %2097 = vmatprep.subr.bf16.mxu1 %v325_v61 }
 0x104   : > { %1990 = vmatpush3.bf16.msra.mxu0 %v325_v61  ;;  %2099 = vmatpush3.bf16.msra.mxu1 %v325_v61 }
 0x106   : > { %v535_v62 = vpop.permute.xlu0 %534 }
 0x107   : > { %v323_v63 = vpop.permute.xlu1 %322 }
 0x108   : > { %1991 = vmatprep.subr.bf16.mxu0 %v323_v63  ;;  %2098 = vmatprep.subr.bf16.mxu1 %v323_v63 }
 0x109   : > { %1992 = vmatpush3.bf16.msra.mxu0 %v323_v63  ;;  %2100 = vmatpush3.bf16.msra.mxu1 %v323_v63 }
 0x10a   : > { %2101 = vmatprep.subr.msk.bf16.mxu1 %vm270_vm11, %v269_v47  ;;  %2013 = vmatprep.subr.bf16.mxu0 %v535_v62  ;;  %v655_v5 = vpop.permute.xlu0 %654 }
 0x10b   : > { %v533_v2 = vpop.permute.xlu1 %532 }
 0x10c   : > { %1994 = vmatmul.mubr.msk.bf16.vlgmr.msra.gmra.mxu0 %vm328_vm9, %v2131_v0  ;;  %1998 = vmatmul.mubr.msk.bf16.vlgmr.msra.gmra.mxu1 %vm328_vm9, %v2132_v1 }
 0x10d   : > { %2002 = vmatpush3.bf16.msra.mxu1 %v2310_v48  ;;  %2014 = vmatpush3.bf16.msra.mxu0 %v535_v62 }
 0x10e   : > { %2102 = vmatprep.subr.msk.bf16.mxu1 %vm270_vm11, %v267_v54  ;;  %2015 = vmatprep.subr.bf16.mxu0 %v533_v2  ;;  %v653_v9 = vpop.permute.xlu0 %652 }
 0x10f   : > { %v775_v6 = vpop.permute.xlu1 %774  ;;  %2005 = vmatprep.mubr.msk.bf16.mxu1 %vm328_vm9, %v2133_v3  ;;  %2017 = vmatprep.mubr.msk.bf16.mxu0 %vm328_vm9, %v2134_v4 }
 0x111   : > { %2004 = vmatpush3.bf16.msra.mxu1 %v2318_v55  ;;  %2016 = vmatpush3.bf16.msra.mxu0 %v533_v2 }
 0x112   : > { %2025 = vmatprep.subr.bf16.mxu1 %v655_v5  ;;  %2037 = vmatprep.subr.bf16.mxu0 %v775_v6  ;;  %v895_v15 = vpop.permute.xlu0 %894 }
 0x113   : > { %v773_v10 = vpop.permute.xlu1 %772 }
 0x114   : > { %2006 = vmatmul.mubr.msk.bf16.vlgmr.msra.gmra.mxu1 %vm328_vm9, %v2135_v7  ;;  %2018 = vmatmul.mubr.msk.bf16.vlgmr.msra.gmra.mxu0 %vm328_vm9, %v2136_v8 }
 0x115   : > { %2026 = vmatpush3.bf16.msra.mxu1 %v655_v5  ;;  %2038 = vmatpush3.bf16.msra.mxu0 %v775_v6 }
 0x116   : > { %2027 = vmatprep.subr.bf16.mxu1 %v653_v9  ;;  %2039 = vmatprep.subr.bf16.mxu0 %v773_v10  ;;  %v893_v21 = vpop.permute.xlu0 %892 }
 0x117   : > { %2009 = vmatprep.mubr.msk.bf16.mxu1 %vm328_vm9, %v2137_v11  ;;  %2021 = vmatprep.mubr.msk.bf16.mxu0 %vm328_vm9, %v2138_v12  ;;  %v1015_v16 = vpop.permute.xlu1 %1014 }
 0x119   : > { %2028 = vmatpush3.bf16.msra.mxu1 %v653_v9  ;;  %2040 = vmatpush3.bf16.msra.mxu0 %v773_v10 }
 0x11a   : > { %2049 = vmatprep.subr.bf16.mxu1 %v895_v15  ;;  %2061 = vmatprep.subr.bf16.mxu0 %v1015_v16  ;;  %v1135_v27 = vpop.permute.xlu0 %1134 }
 0x11b   : > { %v1013_v22 = vpop.permute.xlu1 %1012 }
 0x11c   : > { %2010 = vmatmul.mubr.msk.bf16.gmra.mxu1 %vm328_vm9, %v2139_v13  ;;  %2022 = vmatmul.mubr.msk.bf16.gmra.mxu0 %vm328_vm9, %v2140_v14 }
 0x11d   : > { %2029 = vmatprep.mubr.msk.bf16.mxu1 %vm328_vm9, %v2141_v17  ;;  %2041 = vmatprep.mubr.msk.bf16.mxu0 %vm328_vm9, %v2142_v18 }
 0x11e   : > { %v1133_v35 = vpop.permute.xlu0 %1132 }
 0x11f   : > { %v1255_v28 = vpop.permute.xlu1 %1254 }
 0x123   : > { %v1253_v36 = vpop.permute.xlu1 %1252 }
 0x124   : > { %2030 = vmatmul.mubr.msk.bf16.vlgmr.msra.gmra.mxu1 %vm328_vm9, %v2143_v19  ;;  %2042 = vmatmul.mubr.msk.bf16.vlgmr.msra.gmra.mxu0 %vm328_vm9, %v2144_v20 }
 0x125   : > { %2050 = vmatpush3.bf16.msra.mxu1 %v895_v15  ;;  %2062 = vmatpush3.bf16.msra.mxu0 %v1015_v16 }
 0x126   : > { %2051 = vmatprep.subr.bf16.mxu1 %v893_v21  ;;  %2063 = vmatprep.subr.bf16.mxu0 %v1013_v22 }
 0x127   : > { %2033 = vmatprep.mubr.msk.bf16.mxu1 %vm328_vm9, %v2145_v23  ;;  %2045 = vmatprep.mubr.msk.bf16.mxu0 %vm328_vm9, %v2146_v24 }
 0x129   : > { %2052 = vmatpush3.bf16.msra.mxu1 %v893_v21  ;;  %2064 = vmatpush3.bf16.msra.mxu0 %v1013_v22 }
 0x12a   : > { %2073 = vmatprep.subr.bf16.mxu1 %v1135_v27  ;;  %2085 = vmatprep.subr.bf16.mxu0 %v1255_v28 }
 0x12c   : > { %2034 = vmatmul.mubr.msk.bf16.gmra.mxu1 %vm328_vm9, %v2147_v25  ;;  %2046 = vmatmul.mubr.msk.bf16.gmra.mxu0 %vm328_vm9, %v2148_v26 }
 0x12d   : > { %2053 = vmatprep.mubr.msk.bf16.mxu1 %vm328_vm9, %v2149_v29  ;;  %2065 = vmatprep.mubr.msk.bf16.mxu0 %vm328_vm9, %v2150_v30 }
 0x134   : > { %2054 = vmatmul.mubr.msk.bf16.vlgmr.msra.gmra.mxu1 %vm328_vm9, %v2151_v31  ;;  %2066 = vmatmul.mubr.msk.bf16.vlgmr.msra.gmra.mxu0 %vm328_vm9, %v2152_v32 }
 0x135   : > { %2074 = vmatpush3.bf16.msra.mxu1 %v1135_v27  ;;  %2086 = vmatpush3.bf16.msra.mxu0 %v1255_v28 }
 0x136   : > { %2075 = vmatprep.subr.bf16.mxu1 %v1133_v35  ;;  %2087 = vmatprep.subr.bf16.mxu0 %v1253_v36 }
 0x137   : > { %2057 = vmatprep.mubr.msk.bf16.mxu1 %vm328_vm9, %v2153_v33  ;;  %2069 = vmatprep.mubr.msk.bf16.mxu0 %vm328_vm9, %v2154_v34 }
 0x139   : > { %2076 = vmatpush3.bf16.msra.mxu1 %v1133_v35  ;;  %2088 = vmatpush3.bf16.msra.mxu0 %v1253_v36 }
 0x13c   : > { %2058 = vmatmul.mubr.msk.bf16.gmra.mxu1 %vm328_vm9, %v2155_v37  ;;  %2070 = vmatmul.mubr.msk.bf16.gmra.mxu0 %vm328_vm9, %v2156_v38 }
 0x13d   : > { %2077 = vmatprep.mubr.msk.bf16.mxu1 %vm328_vm9, %v2157_v39  ;;  %2089 = vmatprep.mubr.msk.bf16.mxu0 %vm328_vm9, %v2158_v40 }
 0x144   : > { %2078 = vmatmul.mubr.msk.bf16.vlgmr.msra.gmra.mxu1 %vm328_vm9, %v2159_v41  ;;  %2090 = vmatmul.mubr.msk.bf16.vlgmr.msra.gmra.mxu0 %vm328_vm9, %v2160_v42 }
 0x145   : > { %2081 = vmatprep.mubr.msk.bf16.mxu1 %vm328_vm9, %v2161_v43  ;;  %2093 = vmatprep.mubr.msk.bf16.mxu0 %vm328_vm9, %v2162_v44 }
 0x14c   : > { %2082 = vmatmul.mubr.msk.bf16.gmra.mxu1 %vm328_vm9, %v2163_v45  ;;  %2094 = vmatmul.mubr.msk.bf16.gmra.mxu0 %vm328_vm9, %v2164_v46 }
 0x1cc   : > { %v1995_v47 = vpop.f32.mrf.mxu0  ;;  %v2487_v48 = vpop.f32.mrf.mxu1 }
 0x1ce   : > { %v375_v49 = vpop.f32.mrf.mxu0  ;;  %v2489_v50 = vpop.f32.mrf.mxu1 }
 0x1d0   : > { %v1996_v51 = vpop.f32.mrf.mxu0  ;;  %v2491_v52 = vpop.f32.mrf.mxu1 }
 0x1d2   : > { %v378_v53 = vpop.f32.mrf.mxu0  ;;  %v2493_v54 = vpop.f32.mrf.mxu1 }
 0x1d4   : > { %v2007_v55 = vpop.f32.mrf.mxu1  ;;  %v2019_v56 = vpop.f32.mrf.mxu0 }
 0x1d5   : > { %v481_v57 = vadd.f32 %v2007_v55, %v1995_v47 }
 0x1d6   : > { %v472_v58 = vpop.f32.mrf.mxu1  ;;  %v584_v59 = vpop.f32.mrf.mxu0 }
 0x1d7   : > { %v617_v60 = vadd.f32 %v2019_v56, %v481_v57  ;;  %v473_v61 = vadd.f32 %v472_v58, %v375_v49 }
 0x1d8   : > { %v2008_v62 = vpop.f32.mrf.mxu1  ;;  %v2020_v63 = vpop.f32.mrf.mxu0 }
 0x1d9   : > { %v615_v0 = vadd.f32 %v584_v59, %v473_v61  ;;  %v484_v1 = vadd.f32 %v2008_v62, %v1996_v51 }
 0x1da   : > { %v475_v2 = vpop.f32.mrf.mxu1  ;;  %v587_v3 = vpop.f32.mrf.mxu0 }
 0x1db   : > { %v618_v4 = vadd.f32 %v2020_v63, %v484_v1  ;;  %v476_v5 = vadd.f32 %v475_v2, %v378_v53 }
 0x1dc   : > { %v2011_v6 = vpop.f32.mrf.mxu1  ;;  %v2023_v7 = vpop.f32.mrf.mxu0 }
 0x1dd   : > { %v616_v8 = vadd.f32 %v587_v3, %v476_v5  ;;  %v497_v56 = vadd.f32 %v2011_v6, %v2487_v48 }
 0x1de   : > { %v488_v9 = vpop.f32.mrf.mxu1  ;;  %v600_v10 = vpop.f32.mrf.mxu0 }
 0x1df   : > { %v489_v61 = vadd.f32 %v488_v9, %v2489_v50  ;;  %v621_v1 = vadd.f32 %v2023_v7, %v497_v56  ;;  %v1366_v56 = vpop.permute.xlu0 %1365 }
 0x1e0   : > { %v2012_v11 = vpop.f32.mrf.mxu1  ;;  %v2024_v12 = vpop.f32.mrf.mxu0 }
 0x1e1   : > { %v500_v2 = vadd.f32 %v2012_v11, %v2491_v52  ;;  %v619_v5 = vadd.f32 %v600_v10, %v489_v61  ;;  %v2510_v11 = vpop.permute.xlu1 %1370 }
 0x1e2   : > { %v2495_v13 = vpop.f32.mrf.mxu1  ;;  %v2497_v14 = vpop.f32.mrf.mxu0 }
 0x1e3   : > { %v622_v48 = vadd.f32 %v2024_v12, %v500_v2  ;;  %v492_v10 = vadd.f32 %v2495_v13, %v2493_v54 }
 0x1e4   : > { %v2031_v15 = vpop.f32.mrf.mxu1  ;;  %v2043_v16 = vpop.f32.mrf.mxu0 }
 0x1e5   : > { %v737_v17 = vadd.f32 %v2031_v15, %v617_v60 }
 0x1e6   : > { %v704_v18 = vpop.f32.mrf.mxu1  ;;  %v824_v19 = vpop.f32.mrf.mxu0 }
 0x1e7   : > { %v857_v20 = vadd.f32 %v2043_v16, %v737_v17  ;;  %v735_v21 = vadd.f32 %v704_v18, %v615_v0 }
 0x1e8   : > { %v2032_v22 = vpop.f32.mrf.mxu1  ;;  %v2044_v23 = vpop.f32.mrf.mxu0 }
 0x1e9   : > { %v855_v24 = vadd.f32 %v824_v19, %v735_v21  ;;  %v738_v25 = vadd.f32 %v2032_v22, %v618_v4 }
 0x1ea   : > { %v707_v26 = vpop.f32.mrf.mxu1  ;;  %v827_v27 = vpop.f32.mrf.mxu0 }
 0x1eb   : > { %v858_v28 = vadd.f32 %v2044_v23, %v738_v25  ;;  %v736_v29 = vadd.f32 %v707_v26, %v616_v8 }
 0x1ec   : > { %v2035_v30 = vpop.f32.mrf.mxu1  ;;  %v2047_v31 = vpop.f32.mrf.mxu0 }
 0x1ed   : > { %v856_v32 = vadd.f32 %v827_v27, %v736_v29  ;;  %v741_v8 = vadd.f32 %v2035_v30, %v621_v1 }
 0x1ee   : > { %v720_v33 = vpop.f32.mrf.mxu1  ;;  %v840_v34 = vpop.f32.mrf.mxu0 }
 0x1ef   : > { %v739_v6 = vadd.f32 %v720_v33, %v619_v5  ;;  %v861_v19 = vadd.f32 %v2047_v31, %v741_v8 }
 0x1f0   : > { %v2036_v35 = vpop.f32.mrf.mxu1  ;;  %v2048_v36 = vpop.f32.mrf.mxu0 }
 0x1f1   : > { %v859_v22 = vadd.f32 %v840_v34, %v739_v6 }
 0x1f2   : > { %v2499_v37 = vpop.f32.mrf.mxu1  ;;  %v2501_v38 = vpop.f32.mrf.mxu0 }
 0x1f4   : > { %v2055_v39 = vpop.f32.mrf.mxu1  ;;  %v2067_v40 = vpop.f32.mrf.mxu0 }
 0x1f5   : > { %v977_v41 = vadd.f32 %v2055_v39, %v857_v20  ;;  %v742_v20 = vadd.f32 %v2036_v35, %v622_v48 }
 0x1f6   : > { %v944_v42 = vpop.f32.mrf.mxu1  ;;  %v1064_v43 = vpop.f32.mrf.mxu0 }
 0x1f7   : > { %v1097_v44 = vadd.f32 %v2067_v40, %v977_v41  ;;  %v975_v45 = vadd.f32 %v944_v42, %v855_v24  ;;  %v862_v25 = vadd.f32 %v2048_v36, %v742_v20  ;;  %v620_v40 = vadd.f32 %v2497_v14, %v492_v10  ;;  %v1376_v42 = vpop.permute.xlu1 %1375 }
 0x1f8   : > { %v2056_v46 = vpop.f32.mrf.mxu1  ;;  %v2068_v47 = vpop.f32.mrf.mxu0 }
 0x1f9   : > { %v1095_v49 = vadd.f32 %v1064_v43, %v975_v45  ;;  %v978_v51 = vadd.f32 %v2056_v46, %v858_v28  ;;  %v740_v43 = vadd.f32 %v2499_v37, %v620_v40 }
 0x1fa   : > { %v947_v53 = vpop.f32.mrf.mxu1  ;;  %v1067_v55 = vpop.f32.mrf.mxu0 }
 0x1fb   : > { %v1098_v57 = vadd.f32 %v2068_v47, %v978_v51  ;;  %v976_v58 = vadd.f32 %v947_v53, %v856_v32  ;;  %v860_v14 = vadd.f32 %v2501_v38, %v740_v43 }
 0x1fc   : > { %v2059_v59 = vpop.f32.mrf.mxu1  ;;  %v2071_v60 = vpop.f32.mrf.mxu0 }
 0x1fd   : > { %v1096_v62 = vadd.f32 %v1067_v55, %v976_v58  ;;  %v981_v7 = vadd.f32 %v2059_v59, %v861_v19 }
 0x1fe   : > { %v960_v63 = vpop.f32.mrf.mxu1  ;;  %v1080_v0 = vpop.f32.mrf.mxu0 }
 0x1ff   : > { %v979_v26 = vadd.f32 %v960_v63, %v859_v22  ;;  %v1101_v31 = vadd.f32 %v2071_v60, %v981_v7 }
 0x200   : > { %v2060_v3 = vpop.f32.mrf.mxu1  ;;  %v2072_v4 = vpop.f32.mrf.mxu0 }
 0x201   : > { %v982_v32 = vadd.f32 %v2060_v3, %v862_v25  ;;  %v1099_v41 = vadd.f32 %v1080_v0, %v979_v26  ;;  %v1381_v0 = vpop.permute.xlu0 %1380 }
 0x202   : > { %v963_v15 = vpop.f32.mrf.mxu1  ;;  %v2506_v16 = vpop.f32.mrf.mxu0 }
 0x203   : > { %v980_v37 = vadd.f32 %v963_v15, %v860_v14 }
 0x204   : > { %v2079_v17 = vpop.f32.mrf.mxu1  ;;  %v2091_v18 = vpop.f32.mrf.mxu0 }
 0x205   : > { %v1217_v50 = vadd.f32 %v2079_v17, %v1097_v44  ;;  %v1102_v44 = vadd.f32 %v2072_v4, %v982_v32  ;;  %v1100_v38 = vadd.f32 %v2506_v16, %v980_v37 }
 0x206   : > { %v1184_v9 = vpop.f32.mrf.mxu1  ;;  %v1304_v21 = vpop.f32.mrf.mxu0 }
 0x207   : > { %v2508_v23 = vadd.f32 %v2091_v18, %v1217_v50  ;;  %v1215_v52 = vadd.f32 %v1184_v9, %v1095_v49 }
 0x208   : > { %v2080_v24 = vpop.f32.mrf.mxu1  ;;  %v2092_v12 = vpop.f32.mrf.mxu0 }
 0x209   : > { %v2514_v27 = vadd.f32 %v1304_v21, %v1215_v52  ;;  %v1218_v28 = vadd.f32 %v2080_v24, %v1098_v57 }
 0x20a   : > { %v1187_v29 = vpop.f32.mrf.mxu1  ;;  %v1307_v30 = vpop.f32.mrf.mxu0 }
 0x20b   : > { %v2516_v33 = vadd.f32 %v2092_v12, %v1218_v28  ;;  %v1216_v34 = vadd.f32 %v1187_v29, %v1096_v62 }
 0x20c   : > { %v2083_v35 = vpop.f32.mrf.mxu1  ;;  %v2095_v39 = vpop.f32.mrf.mxu0 }
 0x20d   : > { %v2519_v54 = vadd.f32 %v1307_v30, %v1216_v34  ;;  %v1221_v13 = vadd.f32 %v2083_v35, %v1101_v31 }
 0x20e   : > { %v1200_v36 = vpop.f32.mrf.mxu1  ;;  %v1320_v47 = vpop.f32.mrf.mxu0 }
 0x20f   : > { %v1341_v45 = vadd.f32 %v2095_v39, %v1221_v13  ;;  %v1219_v46 = vadd.f32 %v1200_v36, %v1099_v41 }
 0x210   : > { %v2084_v49 = vpop.f32.mrf.mxu1  ;;  %v2096_v59 = vpop.f32.mrf.mxu0 }
 0x211   : > { %v1339_v51 = vadd.f32 %v1320_v47, %v1219_v46  ;;  %v1222_v53 = vadd.f32 %v2084_v49, %v1102_v44  ;;  %v2522_v55 = vadd.f32 %v1376_v42, %v1341_v45 }
 0x212   : > { %v1203_v63 = vpop.f32.mrf.mxu1  ;;  %v1323_v8 = vpop.f32.mrf.mxu0 }
 0x213   : > { %v2525_v57 = vadd.f32 %v1366_v56, %v1339_v51  ;;  %v1451_v58 = vsel %vm1444_vm12, %v2522_v55, -inf  ;;  %v1342_v60 = vadd.f32 %v2096_v59, %v1222_v53  ;;  %v1537_v62 = vsel %vm1530_vm13, %v2522_v55, -inf }
 0x214   : > { %1452 = vmax.xlane.f32.xlu0 %v1451_v58  ;;  %v1220_v3 = vadd.f32 %v1203_v63, %v1100_v38  ;;  %v1623_v4 = vsel %vm1616_vm15, %v2522_v55, -inf }
 0x215   : > { %v1445_v61 = vsel %vm1444_vm12, %v2525_v57, -inf  ;;  %v2534_v1 = vadd.f32 %v1381_v0, %v1342_v60  ;;  %v1392_v2 = vsel %vm1391_vm14, %v2525_v57, -inf  ;;  %v1531_v16 = vsel %vm1530_vm13, %v2525_v57, -inf }
 0x216   : > { %1446 = vmax.xlane.f32.xlu1 %v1445_v61  ;;  %v1340_v15 = vadd.f32 %v1323_v8, %v1220_v3  ;;  %v1617_v17 = vsel %vm1616_vm15, %v2525_v57, -inf }
 0x217   : > { %v1454_v5 = vsel %vm1444_vm12, %v2534_v1, -inf  ;;  %v1540_v48 = vsel %vm1530_vm13, %v2534_v1, -inf  ;;  %v1626_v18 = vsel %vm1616_vm15, %v2534_v1, -inf  ;;  %v1401_v53 = vsel %vm1391_vm14, %v2534_v1, -inf }
 0x218   : > { %1538 = vmax.xlane.f32.xlu0 %v1537_v62  ;;  %v2547_v6 = vadd.f32 %v2510_v11, %v1340_v15  ;;  %v1398_v62 = vsel %vm1391_vm14, %v2522_v55, -inf }
 0x21a   : > { %1393 = vmax.xlane.f32.xlu1 %v1392_v2  ;;  %v1448_v19 = vsel %vm1444_vm12, %v2547_v6, -inf  ;;  %v1534_v20 = vsel %vm1530_vm13, %v2547_v6, -inf  ;;  %v1395_v50 = vsel %vm1391_vm14, %v2547_v6, -inf  ;;  %v1620_v9 = vsel %vm1616_vm15, %v2547_v6, -inf }
 0x21c   : > { %1624 = vmax.xlane.f32.xlu0 %v1623_v4 }
 0x21e   : > { %1455 = vmax.xlane.f32.xlu1 %v1454_v5 }
 0x220   : > { %1532 = vmax.xlane.f32.xlu0 %v1531_v16 }
 0x222   : > { %1541 = vmax.xlane.f32.xlu1 %v1540_v48  ;;  %v275_v48 = vld [vmem:[%s2751_s2] sm:$0xff] }
 0x224   : > { %1618 = vmax.xlane.f32.xlu0 %v1617_v17 }
 0x226   : > { %1627 = vmax.xlane.f32.xlu1 %v1626_v18  ;;  %v276_v18 = vld [vmem:[%s2751_s2 + $0x8] sm:$0xff] }
 0x228   : > { %1449 = vmax.xlane.f32.xlu0 %v1448_v19 }
 0x22a   : > { %1535 = vmax.xlane.f32.xlu1 %v1534_v20  ;;  %v277_v20 = vld [vmem:[%s2751_s2 + $0x10] sm:$0xff] }
 0x22c   : > { %1396 = vmax.xlane.f32.xlu0 %v1395_v50 }
 0x22e   : > { %1621 = vmax.xlane.f32.xlu1 %v1620_v9 }
 0x29d   : > { %v1453_v21 = vpop.xlane.xlu0 %1452 }
 0x29e   : > { %v1459_v22 = vsub.f32 %v2522_v55, %v1453_v21 }
 0x29f   : > { %v1447_v7 = vpop.xlane.xlu1 %1446 }
 0x2a0   : > { %v1465_v52 = vmul.f32 1.442695, %v1459_v22  ;;  %v1457_v11 = vsub.f32 %v2525_v57, %v1447_v7 }
 0x2a1   : > { %v1539_v10 = vpop.xlane.xlu0 %1538 }
 0x2a2   : > { %2165 = vpow2.f32 %v1465_v52  ;;  %v1461_v24 = vmul.f32 1.442695, %v1457_v11  ;;  %v1545_v12 = vsub.f32 %v2522_v55, %v1539_v10 }
 0x2a3   : > { %v1394_v44 = vpop.xlane.xlu1 %1393 }
 0x2a4   : > { %2167 = vpow2.f32 %v1461_v24  ;;  %v1551_v25 = vmul.f32 1.442695, %v1545_v12  ;;  %v1404_v50 = vsub.f32 %v2525_v57, %v1394_v44 }
 0x2a5   : > { %v1625_v26 = vpop.xlane.xlu0 %1624 }
 0x2a6   : > { %2169 = vpow2.f32 %v1551_v25  ;;  %v1631_v28 = vsub.f32 %v2522_v55, %v1625_v26  ;;  %v1408_v21 = vmul.f32 1.442695, %v1404_v50 }
 0x2a7   : > { %v1456_v45 = vpop.xlane.xlu1 %1455 }
 0x2a8   : > { %v1637_v29 = vmul.f32 1.442695, %v1631_v28  ;;  %v1460_v47 = vsub.f32 %v2534_v1, %v1456_v45 }
 0x2a9   : > { %v1533_v30 = vpop.xlane.xlu0 %1532 }
 0x2aa   : > { %2171 = vpow2.f32 %v1637_v29  ;;  %v1543_v31 = vsub.f32 %v2525_v57, %v1533_v30  ;;  %v1467_v49 = vmul.f32 1.442695, %v1460_v47 }
 0x2ab   : > { %v1542_v46 = vpop.xlane.xlu1 %1541 }
 0x2ac   : > { %v1547_v32 = vmul.f32 1.442695, %v1543_v31  ;;  %v1546_v51 = vsub.f32 %v2534_v1, %v1542_v46 }
 0x2ad   : > { %v1619_v34 = vpop.xlane.xlu0 %1618 }
 0x2ae   : > { %2173 = vpow2.f32 %v1547_v32  ;;  %v1629_v35 = vsub.f32 %v2525_v57, %v1619_v34  ;;  %v1553_v14 = vmul.f32 1.442695, %v1546_v51 }
 0x2af   : > { %v2567_v39 = vpop.eup %2165  ;;  %v1628_v56 = vpop.xlane.xlu1 %1627 }
 0x2b0   : > { %v1633_v40 = vmul.f32 1.442695, %v1629_v35  ;;  %1477 = vrot.lane.b32.xlu0 %v2567_v39, %s2250_s13  ;;  %v1632_v58 = vsub.f32 %v2534_v1, %v1628_v56 }
 0x2b1   : > { %v2571_v41 = vpop.eup %2167  ;;  %v1450_v59 = vpop.xlane.xlu0 %1449 }
 0x2b2   : > { %2175 = vpow2.f32 %v1633_v40  ;;  %1473 = vrot.lane.b32.xlu1 %v2571_v41, %s2250_s13  ;;  %v1639_v60 = vmul.f32 1.442695, %v1632_v58  ;;  %v1458_v61 = vsub.f32 %v2547_v6, %v1450_v59 }
 0x2b3   : > { %v2575_v13 = vpop.eup %2169  ;;  %2177 = vpow2.f32 %v1467_v49  ;;  %v1536_v37 = vpop.xlane.xlu1 %1535 }
 0x2b4   : > { %1563 = vrot.lane.b32.xlu0 %v2575_v13, %s2251_s16  ;;  %2179 = vpow2.f32 %v1553_v14  ;;  %v1463_v63 = vmul.f32 1.442695, %v1458_v61  ;;  %v1544_v0 = vsub.f32 %v2547_v6, %v1536_v37 }
 0x2b5   : > { %2181 = vpow2.f32 %v1639_v60  ;;  %v1397_v9 = vpop.xlane.xlu0 %1396 }
 0x2b6   : > { %2183 = vpow2.f32 %v1463_v63  ;;  %v1549_v2 = vmul.f32 1.442695, %v1544_v0  ;;  %v1405_v22 = vsub.f32 %v2547_v6, %v1397_v9  ;;  %v278_v0 = vld [vmem:[%s2751_s2 + $0x18] sm:$0xff] }
 0x2b7   : > { %v2579_v36 = vpop.eup %2171  ;;  %v1622_v38 = vpop.xlane.xlu1 %1621 }
 0x2b8   : > { %1649 = vrot.lane.b32.xlu0 %v2579_v36, %s2252_s17  ;;  %v1630_v3 = vsub.f32 %v2547_v6, %v1622_v38  ;;  %2185 = vpow2.f32 %v1549_v2  ;;  %v1410_v7 = vmul.f32 1.442695, %v1405_v22 }
 0x2ba   : > { %v1635_v5 = vmul.f32 1.442695, %v1630_v3 }
 0x2bb   : > { %v2583_v42 = vpop.eup %2173 }
 0x2bc   : > { %1559 = vrot.lane.b32.xlu0 %v2583_v42, %s2251_s16  ;;  %2187 = vpow2.f32 %v1635_v5 }
 0x2bd   : > { %2189 = vpow2.f32 %v1408_v21 }
 0x2be   : > { %2191 = vpow2.f32 %v1410_v7 }
 0x2bf   : > { %v2587_v43 = vpop.eup %2175 }
 0x2c0   : > { %1645 = vrot.lane.b32.xlu0 %v2587_v43, %s2252_s17  ;;  %v2601_v4 = vpop.eup %2177 }
 0x2c1   : > { %v2605_v8 = vpop.eup %2179 }
 0x2c2   : > { %v2609_v15 = vpop.eup %2181 }
 0x2c3   : > { %v2613_v16 = vpop.eup %2183 }
 0x2c5   : > { %v2620_v17 = vpop.eup %2185 }
 0x2c9   : > { %v2627_v19 = vpop.eup %2187 }
 0x2ca   : > { %v2638_v12 = vpop.eup %2189 }
 0x2cb   : > { %v1416_v57 = vsel %vm1391_vm14, %v2638_v12, 0.0  ;;  %v2643_v6 = vpop.eup %2191 }
 0x2cc   : > { %v1419_v30 = vsel %vm1391_vm14, %v2643_v6, 0.0 }
 0x2d6   : > { %1402 = vmax.xlane.f32.xlu1 %v1401_v53 }
 0x2df   : > { %1399 = vmax.xlane.f32.xlu0 %v1398_v62 }
 0x2e7   : > { %1479 = vrot.lane.b32.xlu1 %v2601_v4, %s2250_s13 }
 0x2eb   : > { %1565 = vrot.lane.b32.xlu1 %v2605_v8, %s2251_s16 }
 0x2ef   : > { %1651 = vrot.lane.b32.xlu1 %v2609_v15, %s2252_s17 }
 0x2f3   : > { %1475 = vrot.lane.b32.xlu1 %v2613_v16, %s2250_s13 }
 0x2f5   : > { %1345 = vperm.xlu0 %2127, %v275_v48  }
 0x2f7   : > { %1561 = vrot.lane.b32.xlu1 %v2620_v17, %s2251_s16 }
 0x2f9   : > { %1350 = vperm.xlu0 %2127, %v276_v18  }
 0x2fb   : > { %1647 = vrot.lane.b32.xlu1 %v2627_v19, %s2252_s17 }
 0x2fd   : > { %1355 = vperm.xlu0 %2127, %v277_v20  }
 0x322   : > { %v1478_v52 = vpop.permute.xlu0 %1477 }
 0x323   : > { %v1491_v11 = vsel %vm1391_vm14, %v1478_v52, 0.0 }
 0x324   : > { %1492 = vadd.xlane.f32.xlu1 %v1491_v11  ;;  %v1474_v28 = vpop.permute.xlu1 %1473 }
 0x325   : > { %v1485_v31 = vsel %vm1391_vm14, %v1474_v28, 0.0 }
 0x326   : > { %v1564_v10 = vpop.permute.xlu0 %1563 }
 0x327   : > { %v1577_v24 = vsel %vm1391_vm14, %v1564_v10, 0.0 }
 0x328   : > { %1578 = vadd.xlane.f32.xlu0 %v1577_v24 }
 0x32a   : > { %v1650_v25 = vpop.permute.xlu0 %1649 }
 0x32b   : > { %v1663_v26 = vsel %vm1391_vm14, %v1650_v25, 0.0 }
 0x32c   : > { %1417 = vadd.xlane.f32.xlu0 %v1416_v57  ;;  %1664 = vadd.xlane.f32.xlu1 %v1663_v26 }
 0x32e   : > { %v1560_v29 = vpop.permute.xlu0 %1559 }
 0x32f   : > { %v1571_v32 = vsel %vm1391_vm14, %v1560_v29, 0.0 }
 0x330   : > { %1420 = vadd.xlane.f32.xlu0 %v1419_v30  ;;  %1486 = vadd.xlane.f32.xlu1 %v1485_v31 }
 0x332   : > { %v1646_v34 = vpop.permute.xlu0 %1645 }
 0x333   : > { %v1657_v35 = vsel %vm1391_vm14, %v1646_v34, 0.0 }
 0x334   : > { %1572 = vadd.xlane.f32.xlu1 %v1571_v32 }
 0x338   : > { %1658 = vadd.xlane.f32.xlu1 %v1657_v35 }
 0x35f   : > { %v1403_v40 = vpop.xlane.xlu1 %1402 }
 0x360   : > { %v1407_v38 = vsub.f32 %v2534_v1, %v1403_v40 }
 0x362   : > { %v1414_v2 = vmul.f32 1.442695, %v1407_v38 }
 0x363   : > { %v1480_v44 = vpop.permute.xlu1 %1479 }
 0x364   : > { %v1494_v45 = vsel %vm1391_vm14, %v1480_v44, 0.0 }
 0x365   : > { %1495 = vadd.xlane.f32.xlu1 %v1494_v45 }
 0x367   : > { %v1566_v46 = vpop.permute.xlu1 %1565 }
 0x368   : > { %v1400_v47 = vpop.xlane.xlu0 %1399  ;;  %v1580_v49 = vsel %vm1391_vm14, %v1566_v46, 0.0 }
 0x369   : > { %v1406_v51 = vsub.f32 %v2522_v55, %v1400_v47  ;;  %1581 = vadd.xlane.f32.xlu1 %v1580_v49 }
 0x36b   : > { %v1412_v53 = vmul.f32 1.442695, %v1406_v51  ;;  %v1652_v56 = vpop.permute.xlu1 %1651 }
 0x36c   : > { %v1666_v14 = vsel %vm1391_vm14, %v1652_v56, 0.0 }
 0x36d   : > { %2193 = vpow2.f32 %v1412_v53  ;;  %1667 = vadd.xlane.f32.xlu1 %v1666_v14 }
 0x36e   : > { %2195 = vpow2.f32 %v1414_v2 }
 0x36f   : > { %v1476_v58 = vpop.permute.xlu1 %1475 }
 0x370   : > { %v1488_v59 = vsel %vm1391_vm14, %v1476_v58, 0.0  ;;  %v1346_v3 = vpop.permute.xlu0 %1345 }
 0x371   : > { %1489 = vadd.xlane.f32.xlu1 %v1488_v59 }
 0x373   : > { %v1562_v37 = vpop.permute.xlu1 %1561 }
 0x374   : > { %v1574_v60 = vsel %vm1391_vm14, %v1562_v37, 0.0  ;;  %v1351_v5 = vpop.permute.xlu0 %1350 }
 0x375   : > { %1575 = vadd.xlane.f32.xlu1 %v1574_v60  ;;  %v1384_v34 = vadd.f32 %v1351_v5, %v2519_v54 }
 0x377   : > { %v1648_v61 = vpop.permute.xlu1 %1647 }
 0x378   : > { %v1660_v62 = vsel %vm1391_vm14, %v1648_v61, 0.0  ;;  %v1356_v18 = vpop.permute.xlu0 %1355 }
 0x379   : > { %1661 = vadd.xlane.f32.xlu1 %v1660_v62  ;;  %v2670_v11 = vadd.f32 %v1356_v18, %v2508_v23  ;;  %v1383_v23 = vadd.f32 %v1346_v3, %v2514_v27 }
 0x37a   : > { %v2657_v55 = vpop.eup %2193 }
 0x37b   : > { %v1422_v63 = vsel %vm1391_vm14, %v2657_v55, 0.0  ;;  %v2665_v48 = vpop.eup %2195 }
 0x37c   : > { %1423 = vadd.xlane.f32.xlu0 %v1422_v63  ;;  %v1425_v50 = vsel %vm1391_vm14, %v2665_v48, 0.0 }
 0x38a   : > { %1360 = vperm.xlu1 %2128, %v278_v0  }
 0x3ad   : > { %v1493_v20 = vpop.xlane.xlu1 %1492 }
 0x3ae   : > { %2197 = vrcp.f32 %v1493_v20  ;;  %1426 = vadd.xlane.f32.xlu1 %v1425_v50 }
 0x3b1   : > { %v1579_v9 = vpop.xlane.xlu0 %1578 }
 0x3b2   : > { %2199 = vrcp.f32 %v1579_v9 }
 0x3b5   : > { %v1418_v21 = vpop.xlane.xlu0 %1417  ;;  %v1665_v22 = vpop.xlane.xlu1 %1664 }
 0x3b6   : > { %2201 = vrcp.f32 %v1418_v21 }
 0x3b9   : > { %v1421_v7 = vpop.xlane.xlu0 %1420  ;;  %v1487_v1 = vpop.xlane.xlu1 %1486 }
 0x3ba   : > { %2203 = vrcp.f32 %v1421_v7 }
 0x3bb   : > { %v2198_v52 = vpop.eup %2197  ;;  %2205 = vrcp.f32 %v1487_v1 }
 0x3bc   : > { %v1503_v10 = vmul.f32 %v2198_v52, %v2567_v39  ;;  %2207 = vrcp.f32 %v1665_v22 }
 0x3bd   : > { %v1573_v24 = vpop.xlane.xlu1 %1572 }
 0x3be   : > { %2209 = vrcp.f32 %v1573_v24  ;;  %v1507_v25 = vmul.f32 %v1503_v10, %v2670_v11 }
 0x3bf   : > { %v2200_v57 = vpop.eup %2199 }
 0x3c0   : > { %1517 = vrot.lane.b32.xlu0 %v1507_v25, %s2250_s13  ;;  %v1589_v26 = vmul.f32 %v2200_v57, %v2575_v13 }
 0x3c1   : > { %v1659_v28 = vpop.xlane.xlu1 %1658 }
 0x3c2   : > { %2211 = vrcp.f32 %v1659_v28  ;;  %v1593_v29 = vmul.f32 %v1589_v26, %v2670_v11 }
 0x3c3   : > { %v2202_v30 = vpop.eup %2201 }
 0x3c4   : > { %1603 = vrot.lane.b32.xlu0 %v1593_v29, %s2251_s16  ;;  %v1432_v39 = vmul.f32 %v2202_v30, %v2638_v12 }
 0x3c6   : > { %v1436_v13 = vmul.f32 %v1432_v39, %v1383_v23 }
 0x3c7   : > { %v2204_v31 = vpop.eup %2203 }
 0x3c8   : > { %v2206_v32 = vpop.eup %2205  ;;  %1440 = vst.msk [vmem:[%s2685_s28] sm:$0xff] %vm1391_vm14, %v1436_v13  ;;  %v1433_v27 = vmul.f32 %v2204_v31, %v2643_v6 }
 0x3c9   : > { %v1501_v35 = vmul.f32 %v2206_v32, %v2571_v41  ;;  %v2208_v12 = vpop.eup %2207 }
 0x3ca   : > { %v1437_v40 = vmul.f32 %v1433_v27, %v1384_v34  ;;  %v1675_v49 = vmul.f32 %v2208_v12, %v2579_v36 }
 0x3cb   : > { %v2210_v44 = vpop.eup %2209  ;;  %v1505_v45 = vmul.f32 %v1501_v35, %v1383_v23 }
 0x3cc   : > { %v1587_v46 = vmul.f32 %v2210_v44, %v2583_v42  ;;  %1441 = vst.msk [vmem:[%s2685_s28 + $0x8] sm:$0xff] %vm1391_vm14, %v1437_v40  ;;  %v1679_v41 = vmul.f32 %v1675_v49, %v2670_v11 }
 0x3cd   : > { %1513 = vrot.lane.b32.xlu0 %v1505_v45, %s2250_s13 }
 0x3ce   : > { %v1591_v47 = vmul.f32 %v1587_v46, %v1383_v23 }
 0x3cf   : > { %v2212_v54 = vpop.eup %2211 }
 0x3d0   : > { %1599 = vrot.lane.b32.xlu1 %v1591_v47, %s2251_s16  ;;  %v1673_v6 = vmul.f32 %v2212_v54, %v2587_v43 }
 0x3d2   : > { %v1677_v51 = vmul.f32 %v1673_v6, %v1383_v23 }
 0x3d4   : > { %1689 = vrot.lane.b32.xlu1 %v1679_v41, %s2252_s17  ;;  %1685 = vrot.lane.b32.xlu0 %v1677_v51, %s2252_s17 }
 0x3ee   : > { %v1496_v42 = vpop.xlane.xlu1 %1495 }
 0x3ef   : > { %2213 = vrcp.f32 %v1496_v42 }
 0x3f2   : > { %v1582_v53 = vpop.xlane.xlu1 %1581 }
 0x3f3   : > { %2215 = vrcp.f32 %v1582_v53 }
 0x3f6   : > { %v1668_v56 = vpop.xlane.xlu1 %1667 }
 0x3fa   : > { %v1490_v14 = vpop.xlane.xlu1 %1489 }
 0x3fb   : > { %2217 = vrcp.f32 %v1490_v14 }
 0x3fc   : > { %v2214_v59 = vpop.eup %2213 }
 0x3fd   : > { %v1504_v61 = vmul.f32 %v2214_v59, %v2601_v4 }
 0x3fe   : > { %v1576_v36 = vpop.xlane.xlu1 %1575 }
 0x3ff   : > { %2219 = vrcp.f32 %v1576_v36 }
 0x400   : > { %v2216_v62 = vpop.eup %2215 }
 0x401   : > { %v1590_v38 = vmul.f32 %v2216_v62, %v2605_v8 }
 0x402   : > { %v1662_v58 = vpop.xlane.xlu1 %1661 }
 0x403   : > { %2221 = vrcp.f32 %v1662_v58 }
 0x405   : > { %v1424_v43 = vpop.xlane.xlu0 %1423 }
 0x406   : > { %2223 = vrcp.f32 %v1424_v43  ;;  %v1361_v37 = vpop.permute.xlu1 %1360 }
 0x407   : > { %v1386_v60 = vadd.f32 %v1361_v37, %v2516_v33  ;;  %2225 = vrcp.f32 %v1668_v56 }
 0x408   : > { %v2218_v0 = vpop.eup %2217 }
 0x409   : > { %v1508_v63 = vmul.f32 %v1504_v61, %v1386_v60  ;;  %v1594_v2 = vmul.f32 %v1590_v38, %v1386_v60  ;;  %v1502_v3 = vmul.f32 %v2218_v0, %v2613_v16 }
 0x40b   : > { %1519 = vrot.lane.b32.xlu0 %v1508_v63, %s2250_s13  ;;  %v1506_v18 = vmul.f32 %v1502_v3, %v1384_v34 }
 0x40c   : > { %v2220_v5 = vpop.eup %2219 }
 0x40d   : > { %v1588_v33 = vmul.f32 %v2220_v5, %v2620_v17 }
 0x40f   : > { %1605 = vrot.lane.b32.xlu0 %v1594_v2, %s2251_s16  ;;  %v1592_v9 = vmul.f32 %v1588_v33, %v1384_v34 }
 0x410   : > { %v2222_v20 = vpop.eup %2221 }
 0x411   : > { %v1674_v8 = vmul.f32 %v2222_v20, %v2627_v19 }
 0x413   : > { %v2224_v4 = vpop.eup %2223  ;;  %1515 = vrot.lane.b32.xlu0 %v1506_v18, %s2250_s13  ;;  %v1678_v17 = vmul.f32 %v1674_v8, %v1384_v34 }
 0x414   : > { %v1434_v50 = vmul.f32 %v2224_v4, %v2657_v55  ;;  %v2226_v16 = vpop.eup %2225 }
 0x415   : > { %v1676_v22 = vmul.f32 %v2226_v16, %v2609_v15 }
 0x416   : > { %v1438_v21 = vmul.f32 %v1434_v50, %v2670_v11 }
 0x417   : > { %1601 = vrot.lane.b32.xlu0 %v1592_v9, %s2251_s16  ;;  %v1680_v7 = vmul.f32 %v1676_v22, %v1386_v60 }
 0x418   : > { %1442 = vst.msk [vmem:[%s2685_s28 + $0x10] sm:$0xff] %vm1391_vm14, %v1438_v21 }
 0x41b   : > { %1687 = vrot.lane.b32.xlu0 %v1678_v17, %s2252_s17 }
 0x41f   : > { %1691 = vrot.lane.b32.xlu0 %v1680_v7, %s2252_s17 }
 0x432   : > { %v1518_v19 = vpop.permute.xlu0 %1517 }
 0x433   : > { %1921 = vst.msk [vmem:[%s2685_s28 + $0x30] sm:$0xff] %vm1391_vm14, %v1518_v19 }
 0x436   : > { %v1604_v55 = vpop.permute.xlu0 %1603 }
 0x437   : > { %1925 = vst.msk [vmem:[%s2685_s28 + $0x50] sm:$0xff] %vm1391_vm14, %v1604_v55  ;;  %v1427_v1 = vpop.xlane.xlu1 %1426 }
 0x438   : > { %2227 = vrcp.f32 %v1427_v1 }
 0x43f   : > { %v1514_v52 = vpop.permute.xlu0 %1513 }
 0x440   : > { %1919 = vst.msk [vmem:[%s2685_s28 + $0x20] sm:$0xff] %vm1391_vm14, %v1514_v52 }
 0x442   : > { %v1600_v15 = vpop.permute.xlu1 %1599 }
 0x443   : > { %1923 = vst.msk [vmem:[%s2685_s28 + $0x40] sm:$0xff] %vm1391_vm14, %v1600_v15 }
 0x445   : > { %v2228_v11 = vpop.eup %2227 }
 0x446   : > { %v1686_v10 = vpop.permute.xlu0 %1685  ;;  %v1690_v24 = vpop.permute.xlu1 %1689  ;;  %v1435_v25 = vmul.f32 %v2228_v11, %v2665_v48 }
 0x447   : > { %1927 = vst.msk [vmem:[%s2685_s28 + $0x60] sm:$0xff] %vm1391_vm14, %v1686_v10  ;;  %1929 = vst.msk [vmem:[%s2685_s28 + $0x70] sm:$0xff] %vm1391_vm14, %v1690_v24 }
 0x448   : > { %v1439_v57 = vmul.f32 %v1435_v25, %v1386_v60 }
 0x44a   : > { %1443 = vst.msk [vmem:[%s2685_s28 + $0x18] sm:$0xff] %vm1391_vm14, %v1439_v57 }
 0x47d   : > { %v1520_v26 = vpop.permute.xlu0 %1519 }
 0x47e   : > { %1922 = vst.msk [vmem:[%s2685_s28 + $0x38] sm:$0xff] %vm1391_vm14, %v1520_v26 }
 0x481   : > { %v1606_v28 = vpop.permute.xlu0 %1605 }
 0x482   : > { %1926 = vst.msk [vmem:[%s2685_s28 + $0x58] sm:$0xff] %vm1391_vm14, %v1606_v28 }
 0x485   : > { %v1516_v29 = vpop.permute.xlu0 %1515 }
 0x486   : > { %1920 = vst.msk [vmem:[%s2685_s28 + $0x28] sm:$0xff] %vm1391_vm14, %v1516_v29 }
 0x489   : > { %v1602_v30 = vpop.permute.xlu0 %1601 }
 0x48a   : > { %1924 = vst.msk [vmem:[%s2685_s28 + $0x48] sm:$0xff] %vm1391_vm14, %v1602_v30 }
 0x48d   : > { %v1688_v48 = vpop.permute.xlu0 %1687 }
 0x48e   : > { %1928 = vst.msk [vmem:[%s2685_s28 + $0x68] sm:$0xff] %vm1391_vm14, %v1688_v48 }
 0x491   : > { %v1692_v23 = vpop.permute.xlu0 %1691 }
 0x492   : > { %1930 = vst.msk [vmem:[%s2685_s28 + $0x78] sm:$0xff] %vm1391_vm14, %v1692_v23 }
 0x493 PF: > { %s13_s12 = sadd.s32 1, %s2235_s12  }
 0x494   : > { %p10_p4 = scmp.ge.s32.totalorder %s13_s12, 4  }
 0x496   :  { %12 = sbr.rel (!%p10_p4) target bundleno = 1 (0x1), region = 76 }

</bundles_post_ra>
